<compile_context>
chip_gen: v7x
topology: tpu7x:2x2x1
jax: 0.10.0
libtpu: 0.0.40
codegen_flags: <defaults>
</compile_context>

<pallas_src>
import functools

import numpy as np

import jax
import jax.numpy as jnp
from jax import lax
from jax.experimental import pallas as pl
from jax.experimental.pallas import tpu as pltpu


# ----------------------------------------------------------------------------
# Fused kernel: whole RepNCSPELAN forward on a (C, B_TILE*H*W) channel-major slab
# ----------------------------------------------------------------------------
def _repncspelan_kernel(x_ref, mask_ref, w_ref, b_ref, o_ref, *,
                        H, W, b_tile, part_ch, n_blocks, layout):
    M = b_tile * H * W
    cursor = [0]

    def next_param():
        row, cout, k = layout[cursor[0]]          # static Python ints
        cursor[0] += 1
        w = w_ref[row:row + cout, :k]             # (cout, k) bf16
        b = b_ref[row:row + cout, :]              # (cout, 1) f32
        return w, b

    def silu(y):                                  # y * sigmoid(y); one EUP push (tanh)
        return y * (0.5 * jnp.tanh(0.5 * y) + 0.5)

    def matmul(w_bf16, x_f32):                    # bf16 x bf16 -> f32 on the MXU
        return jnp.dot(w_bf16, x_f32.astype(jnp.bfloat16),
                       preferred_element_type=jnp.float32)

    def conv1x1(x):
        w, b = next_param()
        return silu(matmul(w, x) + b)

    def conv3x3(x):
        # 3x3 conv (stride 1, pad 1) + BN + SiLU as ONE K = 9*Cin matmul.  Tap t
        # reads flat offset off = sy*W + sx (roll by -off, jnp.roll semantics).
        # With the batch folded into the lane axis, the per-pixel border mask also
        # zeroes any roll bleed across image boundaries: a tap is only unmasked
        # when its source pixel lies inside the SAME image.
        w, b = next_param()
        taps = []
        for t in range(9):
            sy, sx = t // 3 - 1, t % 3 - 1
            off = sy * W + sx
            if off == 0:
                taps.append(x)                    # center tap: no shift, no mask
            else:
                taps.append(pltpu.roll(x, (-off) % M, 1) * mask_ref[t:t + 1, :])
        xt = jnp.concatenate(taps, axis=0)        # (9*Cin, M); 8-row tile-aligned pieces
        return silu(matmul(w, xt) + b)

    def repncsp(x):
        x1 = conv1x1(x)                           # conv1
        for _ in range(n_blocks):                 # RepNCSPBottleneck(neck, neck)
            y = conv3x3(x1)                       #   RepConv (3x3 + folded 1x1) + SiLU
            y = conv3x3(y)                        #   conv2: 3x3 + SiLU
            x1 = x1 + y                           #   residual (in_ch == out_ch)
        x2 = conv1x1(x)                           # conv2
        # conv3 on the channel concat: single K = 2*neck_p matmul
        return conv1x1(jnp.concatenate([x1, x2], axis=0))

    x = x_ref[...]                                # (Cin, M) f32
    y = conv1x1(x)                                # ELAN conv1 -> (part_ch, M)
    half = part_ch // 2
    x1, x2 = y[:half], y[half:]                   # torch .chunk(2, dim=1)
    x3 = conv3x3(repncsp(x2))                     # self.conv2 = RepNCSP + 3x3
    x4 = conv3x3(repncsp(x3))                     # self.conv3 = RepNCSP + 3x3
    # ELAN conv4 on the 4-way concat: single K = part + 2*proc matmul
    out = conv1x1(jnp.concatenate([x1, x2, x3, x4], axis=0))
    o_ref[...] = out.astype(o_ref.dtype)


# ----------------------------------------------------------------------------
# Host-side parameter construction: Conv + BatchNorm(eval) folding, neck padding,
# and packing of all 14 convs into one bf16 weight slab + one f32 bias slab.
# ----------------------------------------------------------------------------
def _fold_conv_bn(key, cin, cout, k, eps=1e-3):
    """Random Conv2d(cin,cout,k,bias=False) + BatchNorm2d(eps=1e-3) folded (eval).
    Returns folded weight in torch OIHW layout and folded bias."""
    kw, k1, k2, k3, k4 = jax.random.split(key, 5)
    w = jax.random.normal(kw, (cout, cin, k, k), jnp.float32) * 0.1
    gamma = jax.random.uniform(k1, (cout,), jnp.float32, 0.5, 1.5)
    beta = jax.random.normal(k2, (cout,), jnp.float32) * 0.1
    mean = jax.random.normal(k3, (cout,), jnp.float32) * 0.1
    var = jax.random.uniform(k4, (cout,), jnp.float32, 0.5, 1.5)
    scale = gamma / jnp.sqrt(var + eps)
    return w * scale[:, None, None, None], beta - mean * scale


def make_params(key, in_ch, out_ch, part_ch, proc_ch, repeat_num=1, csp_expand=0.5):
    """Returns (w_slab bf16, b_slab f32, layout, ref_convs).

    layout[i] = (row_offset, cout, K) for the i-th conv in kernel consumption
    order; ref_convs is the unpadded f32 (OIHW weight, bias) list for the
    pure-JAX reference."""
    keys = iter(jax.random.split(key, 64))
    slab_entries = []     # (w2d f32 (cout_p, K), bias f32 (cout_p,)) padded
    ref_convs = []        # (w OIHW f32, bias f32) unpadded, same order

    def fold(cin, cout, k):
        return _fold_conv_bn(next(keys), cin, cout, k)

    def emit_1x1(w, b, cin_pad=None, cout_pad=None):
        cout, cin = w.shape[:2]
        cin_pad, cout_pad = cin_pad or cin, cout_pad or cout
        w2 = jnp.zeros((cout_pad, cin_pad), jnp.float32).at[:cout, :cin].set(w[:, :, 0, 0])
        b2 = jnp.zeros((cout_pad,), jnp.float32).at[:cout].set(b)
        slab_entries.append((w2, b2))

    def emit_3x3(w, b, cin_pad=None, cout_pad=None):
        cout, cin = w.shape[:2]
        cin_pad, cout_pad = cin_pad or cin, cout_pad or cout
        wp = jnp.zeros((cout_pad, cin_pad, 3, 3), jnp.float32).at[:cout, :cin].set(w)
        # OIHW -> (O, kh, kw, I) -> (O, 9*I); K index = (kh*3+kw)*cin_pad + i,
        # matching the in-kernel tap stacking order t = (sy+1)*3 + (sx+1).
        w2 = jnp.transpose(wp, (0, 2, 3, 1)).reshape(cout_pad, 9 * cin_pad)
        b2 = jnp.zeros((cout_pad,), jnp.float32).at[:cout].set(b)
        slab_entries.append((w2, b2))

    def add_1x1(cin, cout, cin_pad=None, cout_pad=None):
        w, b = fold(cin, cout, 1)
        ref_convs.append((w, b))
        emit_1x1(w, b, cin_pad, cout_pad)

    def add_3x3(cin, cout, cin_pad=None, cout_pad=None):
        w, b = fold(cin, cout, 3)
        ref_convs.append((w, b))
        emit_3x3(w, b, cin_pad, cout_pad)

    def add_repconv(cin, cout, cin_pad=None, cout_pad=None):
        # RepConv = (3x3 + BN) + (1x1 + BN), summed before SiLU.  Exact
        # re-parameterization: add the 1x1 weight to the 3x3 center tap.
        w3, b3 = fold(cin, cout, 3)
        w1, b1 = fold(cin, cout, 1)
        w3 = w3.at[:, :, 1, 1].add(w1[:, :, 0, 0])
        b3 = b3 + b1
        ref_convs.append((w3, b3))
        emit_3x3(w3, b3, cin_pad, cout_pad)

    def add_repncsp(cin, cout):
        neck = int(cout * csp_expand)
        neck_p = max(8, -(-neck // 8) * 8)        # pad the CSP neck to 8-sublane tiles
        add_1x1(cin, neck, cout_pad=neck_p)                               # conv1
        for _ in range(repeat_num):                                       # bottleneck
            add_repconv(neck, neck, cin_pad=neck_p, cout_pad=neck_p)      #   conv1
            add_3x3(neck, neck, cin_pad=neck_p, cout_pad=neck_p)          #   conv2
        add_1x1(cin, neck, cout_pad=neck_p)                               # conv2
        # conv3 consumes concat([x1, x2]) whose halves are zero-padded to neck_p:
        w, b = fold(2 * neck, cout, 1)
        ref_convs.append((w, b))
        w2 = jnp.zeros((cout, 2 * neck_p), jnp.float32)
        w2 = w2.at[:, :neck].set(w[:, :neck, 0, 0])
        w2 = w2.at[:, neck_p:neck_p + neck].set(w[:, neck:, 0, 0])
        slab_entries.append((w2, b))

    add_1x1(in_ch, part_ch)                       # ELAN conv1
    add_repncsp(part_ch // 2, proc_ch)            # conv2[0] = RepNCSP
    add_3x3(proc_ch, proc_ch)                     # conv2[1] = 3x3
    add_repncsp(proc_ch, proc_ch)                 # conv3[0] = RepNCSP
    add_3x3(proc_ch, proc_ch)                     # conv3[1] = 3x3
    add_1x1(part_ch + 2 * proc_ch, out_ch)        # conv4

    # Pack every folded conv into ONE bf16 weight slab + ONE f32 bias slab.
    lanes = -(-max(w.shape[1] for w, _ in slab_entries) // 128) * 128
    layout, row = [], 0
    for w, _ in slab_entries:
        layout.append((row, int(w.shape[0]), int(w.shape[1])))
        row += -(-int(w.shape[0]) // 8) * 8       # keep row offsets sublane-aligned
    w_slab = jnp.zeros((row, lanes), jnp.float32)
    b_slab = jnp.zeros((row, 1), jnp.float32)
    for (off, cout, k), (w, b) in zip(layout, slab_entries):
        w_slab = w_slab.at[off:off + cout, :k].set(w)
        b_slab = b_slab.at[off:off + cout, 0].set(b)
    return w_slab.astype(jnp.bfloat16), b_slab, tuple(layout), ref_convs


def _border_masks(h, w, b_tile):
    """Constant (9, b_tile*h*w) zero-padding masks for the 3x3 taps (hoisted)."""
    hw = h * w
    p = np.arange(b_tile * hw) % hw               # within-image pixel index
    hh, ww = p // w, p % w
    rows = []
    for t in range(9):
        sy, sx = t // 3 - 1, t % 3 - 1
        ok = (hh + sy >= 0) & (hh + sy < h) & (ww + sx >= 0) & (ww + sx < w)
        rows.append(ok)
    return jnp.asarray(np.stack(rows).astype(np.float32))


# ----------------------------------------------------------------------------
# Forward wrapper: one pallas_call for the whole block, grid over batch tiles
# ----------------------------------------------------------------------------
def repncspelan_forward(x_nchw, w_slab, b_slab, *, layout, part_ch, out_ch,
                        n_blocks=1, batch_tile=None):
    n, cin, h, w = x_nchw.shape
    hw = h * w
    if batch_tile is None:
        # >= 2 grid steps when n >= 2 (keeps both v7x TensorCores busy) while
        # capping the per-step lane width so the working set stays small even on
        # v7x's 64 MiB VMEM.
        batch_tile = max(1, min(8, n // 2)) if n >= 2 else 1
    n_pad = pl.cdiv(n, batch_tile) * batch_tile
    grid_n = n_pad // batch_tile
    m_cols = batch_tile * hw
    if grid_n > 1:
        assert m_cols % 128 == 0, "batch_tile * H * W must be a multiple of 128"

    # Channel-major layout across the batch: column index m = b*HW + (y*W + x).
    x_flat = x_nchw.reshape(n, cin, hw)
    if n_pad != n:
        x_flat = jnp.pad(x_flat, ((0, n_pad - n), (0, 0), (0, 0)))
    x_cm = jnp.transpose(x_flat, (1, 0, 2)).reshape(cin, n_pad * hw)

    mask = _border_masks(h, w, batch_tile)

    kernel = functools.partial(
        _repncspelan_kernel, H=h, W=w, b_tile=batch_tile,
        part_ch=part_ch, n_blocks=n_blocks, layout=layout)

    out = pl.pallas_call(
        kernel,
        out_shape=jax.ShapeDtypeStruct((out_ch, n_pad * hw), jnp.float32),
        grid=(grid_n,),
        in_specs=[
            pl.BlockSpec((cin, m_cols), lambda i: (0, i)),        # activations
            pl.BlockSpec(mask.shape, lambda i: (0, 0)),           # border masks
            pl.BlockSpec(w_slab.shape, lambda i: (0, 0)),         # bf16 weight slab
            pl.BlockSpec(b_slab.shape, lambda i: (0, 0)),         # f32 bias slab
        ],
        out_specs=pl.BlockSpec((out_ch, m_cols), lambda i: (0, i)),
        compiler_params=pltpu.CompilerParams(
            dimension_semantics=("parallel",),
            vmem_limit_bytes=48 * 1024 * 1024,    # > v5e's 16 MiB default; < v7x's 64 MiB
        ),
    )(x_cm, mask, w_slab, b_slab)

    out = jnp.transpose(out.reshape(out_ch, n_pad, hw), (1, 0, 2))[:n]
    return out.reshape(n, out_ch, h, w)


# ----------------------------------------------------------------------------
# Pure-JAX f32 reference (same folded weights) for validation
# ----------------------------------------------------------------------------
def repncspelan_reference(x, ref_convs, *, part_ch, n_blocks=1):
    it = iter(ref_convs)

    def conv(x):
        w, b = next(it)
        pad = (w.shape[-1] - 1) // 2
        y = lax.conv_general_dilated(x, w, (1, 1), [(pad, pad), (pad, pad)],
                                     dimension_numbers=("NCHW", "OIHW", "NCHW"))
        y = y + b[None, :, None, None]
        return y * jax.nn.sigmoid(y)

    def repncsp(x):
        x1 = conv(x)
        for _ in range(n_blocks):
            y = conv(x1)
            y = conv(y)
            x1 = x1 + y
        x2 = conv(x)
        return conv(jnp.concatenate([x1, x2], axis=1))

    y = conv(x)
    half = part_ch // 2
    x1, x2 = y[:, :half], y[:, half:]
    x3 = conv(repncsp(x2))
    x4 = conv(repncsp(x3))
    return conv(jnp.concatenate([x1, x2, x3, x4], axis=1))


if __name__ == "__main__":
    key = jax.random.PRNGKey(0)
    kx, kp = jax.random.split(key)

    N, H, W = 2, 16, 16
    in_ch, out_ch, part_ch = 16, 32, 16
    proc_ch = part_ch // 2            # default process_channels = part_channels // 2

    x = jax.random.normal(kx, (N, in_ch, H, W), jnp.float32)   # NCHW, like PyTorch
    w_slab, b_slab, layout, ref_convs = make_params(kp, in_ch, out_ch, part_ch, proc_ch)

    fwd = jax.jit(functools.partial(
        repncspelan_forward, layout=layout, part_ch=part_ch, out_ch=out_ch, n_blocks=1))
    out = jax.block_until_ready(fwd(x, w_slab, b_slab))

    assert out.shape == (N, out_ch, H, W), out.shape
    assert bool(jnp.all(jnp.isfinite(out)))

    # Validate against a pure-JAX f32 reference (kernel matmuls are bf16, so use a
    # normalized tolerance well above bf16 accumulation noise but far below any
    # structural error).
    ref = repncspelan_reference(x, ref_convs, part_ch=part_ch, n_blocks=1)
    err = float(jnp.max(jnp.abs(out - ref)) / (jnp.max(jnp.abs(ref)) + 1e-6))
    assert err < 0.1, f"kernel/reference mismatch: normalized max err = {err}"
    print("KERNEL_OK")
</pallas_src>

<mosaic_0001>
module attributes {stable_mosaic.version = 11 : i64} {
  func.func @_repncspelan_kernel(%arg0: i32, %arg1: memref<16x256xf32, #tpu.memory_space<vmem>>, %arg2: memref<9x256xf32, #tpu.memory_space<vmem>>, %arg3: memref<144x128xbf16, #tpu.memory_space<vmem>>, %arg4: memref<144x1xf32, #tpu.memory_space<vmem>>, %arg5: memref<32x256xf32, #tpu.memory_space<vmem>>) attributes {dimension_semantics = [#tpu.dimension_semantics<parallel>], iteration_bounds = array<i64: 2>, scalar_prefetch = 0 : i64, scratch_operands = 0 : i64, tpu.core_type = #tpu.core_type<tc>, window_params = [{transform_indices = @transform_0, window_bounds = array<i64: 16, 256>}, {pipeline_mode = #tpu.pipeline_mode<synchronous>, transform_indices = @transform_1, window_bounds = array<i64: 9, 256>}, {pipeline_mode = #tpu.pipeline_mode<synchronous>, transform_indices = @transform_2, window_bounds = array<i64: 144, 128>}, {pipeline_mode = #tpu.pipeline_mode<synchronous>, transform_indices = @transform_3, window_bounds = array<i64: 144, 1>}, {transform_indices = @transform_4, window_bounds = array<i64: 32, 256>}]} {
    %c0 = arith.constant 0 : index
    %c0_0 = arith.constant 0 : index
    %0 = vector.load %arg1[%c0, %c0_0] : memref<16x256xf32, #tpu.memory_space<vmem>>, vector<16x256xf32>
    %c0_1 = arith.constant 0 : index
    %c0_2 = arith.constant 0 : index
    %1 = vector.load %arg3[%c0_1, %c0_2] : memref<144x128xbf16, #tpu.memory_space<vmem>>, vector<16x16xbf16>
    %c0_3 = arith.constant 0 : index
    %c0_4 = arith.constant 0 : index
    %2 = vector.load %arg4[%c0_3, %c0_4] : memref<144x1xf32, #tpu.memory_space<vmem>>, vector<16x1xf32>
    %3 = arith.truncf %0 : vector<16x256xf32> to vector<16x256xbf16>
    %cst = arith.constant dense<0.000000e+00> : vector<16x256xf32>
    %4 = tpu.matmul %1, %3, %cst {dimension_numbers = #tpu.dot_dimension_numbers<[1], [0], [0], [1], [0, 0, 1, 1], [], []>} : vector<16x16xbf16>, vector<16x256xbf16>, vector<16x256xf32> -> vector<16x256xf32>
    %5 = vector.broadcast %2 : vector<16x1xf32> to vector<16x256xf32>
    %6 = arith.addf %4, %5 : vector<16x256xf32>
    %cst_5 = arith.constant 5.000000e-01 : f32
    %7 = vector.broadcast %cst_5 : f32 to vector<16x256xf32>
    %8 = arith.mulf %7, %6 : vector<16x256xf32>
    %9 = math.tanh %8 : vector<16x256xf32>
    %cst_6 = arith.constant 5.000000e-01 : f32
    %10 = vector.broadcast %cst_6 : f32 to vector<16x256xf32>
    %11 = arith.mulf %10, %9 : vector<16x256xf32>
    %cst_7 = arith.constant 5.000000e-01 : f32
    %12 = vector.broadcast %cst_7 : f32 to vector<16x256xf32>
    %13 = arith.addf %11, %12 : vector<16x256xf32>
    %14 = arith.mulf %6, %13 : vector<16x256xf32>
    %15 = vector.extract_strided_slice %14 {offsets = [0, 0], sizes = [8, 256], strides = [1, 1]} : vector<16x256xf32> to vector<8x256xf32>
    %16 = vector.extract_strided_slice %14 {offsets = [8, 0], sizes = [8, 256], strides = [1, 1]} : vector<16x256xf32> to vector<8x256xf32>
    %c16 = arith.constant 16 : index
    %c0_8 = arith.constant 0 : index
    %17 = vector.load %arg3[%c16, %c0_8] : memref<144x128xbf16, #tpu.memory_space<vmem>>, vector<8x8xbf16>
    %c16_9 = arith.constant 16 : index
    %c0_10 = arith.constant 0 : index
    %18 = vector.load %arg4[%c16_9, %c0_10] : memref<144x1xf32, #tpu.memory_space<vmem>>, vector<8x1xf32>
    %19 = arith.truncf %16 : vector<8x256xf32> to vector<8x256xbf16>
    %cst_11 = arith.constant dense<0.000000e+00> : vector<8x256xf32>
    %20 = tpu.matmul %17, %19, %cst_11 {dimension_numbers = #tpu.dot_dimension_numbers<[1], [0], [0], [1], [0, 0, 1, 1], [], []>} : vector<8x8xbf16>, vector<8x256xbf16>, vector<8x256xf32> -> vector<8x256xf32>
    %21 = vector.broadcast %18 : vector<8x1xf32> to vector<8x256xf32>
    %22 = arith.addf %20, %21 : vector<8x256xf32>
    %cst_12 = arith.constant 5.000000e-01 : f32
    %23 = vector.broadcast %cst_12 : f32 to vector<8x256xf32>
    %24 = arith.mulf %23, %22 : vector<8x256xf32>
    %25 = math.tanh %24 : vector<8x256xf32>
    %cst_13 = arith.constant 5.000000e-01 : f32
    %26 = vector.broadcast %cst_13 : f32 to vector<8x256xf32>
    %27 = arith.mulf %26, %25 : vector<8x256xf32>
    %cst_14 = arith.constant 5.000000e-01 : f32
    %28 = vector.broadcast %cst_14 : f32 to vector<8x256xf32>
    %29 = arith.addf %27, %28 : vector<8x256xf32>
    %30 = arith.mulf %22, %29 : vector<8x256xf32>
    %c24 = arith.constant 24 : index
    %c0_15 = arith.constant 0 : index
    %31 = vector.load %arg3[%c24, %c0_15] : memref<144x128xbf16, #tpu.memory_space<vmem>>, vector<8x72xbf16>
    %c24_16 = arith.constant 24 : index
    %c0_17 = arith.constant 0 : index
    %32 = vector.load %arg4[%c24_16, %c0_17] : memref<144x1xf32, #tpu.memory_space<vmem>>, vector<8x1xf32>
    %c17_i32 = arith.constant 17 : i32
    %33 = tpu.dynamic_rotate %30 by %c17_i32 dim 1 : vector<8x256xf32>, i32 -> vector<8x256xf32>
    %c0_18 = arith.constant 0 : index
    %c0_19 = arith.constant 0 : index
    %34 = vector.load %arg2[%c0_18, %c0_19] : memref<9x256xf32, #tpu.memory_space<vmem>>, vector<1x256xf32>
    %35 = vector.broadcast %34 : vector<1x256xf32> to vector<8x256xf32>
    %36 = arith.mulf %33, %35 : vector<8x256xf32>
    %c16_i32 = arith.constant 16 : i32
    %37 = tpu.dynamic_rotate %30 by %c16_i32 dim 1 : vector<8x256xf32>, i32 -> vector<8x256xf32>
    %c1 = arith.constant 1 : index
    %c0_20 = arith.constant 0 : index
    %38 = vector.load %arg2[%c1, %c0_20] : memref<9x256xf32, #tpu.memory_space<vmem>>, vector<1x256xf32>
    %39 = vector.broadcast %38 : vector<1x256xf32> to vector<8x256xf32>
    %40 = arith.mulf %37, %39 : vector<8x256xf32>
    %c15_i32 = arith.constant 15 : i32
    %41 = tpu.dynamic_rotate %30 by %c15_i32 dim 1 : vector<8x256xf32>, i32 -> vector<8x256xf32>
    %c2 = arith.constant 2 : index
    %c0_21 = arith.constant 0 : index
    %42 = vector.load %arg2[%c2, %c0_21] : memref<9x256xf32, #tpu.memory_space<vmem>>, vector<1x256xf32>
    %43 = vector.broadcast %42 : vector<1x256xf32> to vector<8x256xf32>
    %44 = arith.mulf %41, %43 : vector<8x256xf32>
    %c1_i32 = arith.constant 1 : i32
    %45 = tpu.dynamic_rotate %30 by %c1_i32 dim 1 : vector<8x256xf32>, i32 -> vector<8x256xf32>
    %c3 = arith.constant 3 : index
    %c0_22 = arith.constant 0 : index
    %46 = vector.load %arg2[%c3, %c0_22] : memref<9x256xf32, #tpu.memory_space<vmem>>, vector<1x256xf32>
    %47 = vector.broadcast %46 : vector<1x256xf32> to vector<8x256xf32>
    %48 = arith.mulf %45, %47 : vector<8x256xf32>
    %c255_i32 = arith.constant 255 : i32
    %49 = tpu.dynamic_rotate %30 by %c255_i32 dim 1 : vector<8x256xf32>, i32 -> vector<8x256xf32>
    %c5 = arith.constant 5 : index
    %c0_23 = arith.constant 0 : index
    %50 = vector.load %arg2[%c5, %c0_23] : memref<9x256xf32, #tpu.memory_space<vmem>>, vector<1x256xf32>
    %51 = vector.broadcast %50 : vector<1x256xf32> to vector<8x256xf32>
    %52 = arith.mulf %49, %51 : vector<8x256xf32>
    %c241_i32 = arith.constant 241 : i32
    %53 = tpu.dynamic_rotate %30 by %c241_i32 dim 1 : vector<8x256xf32>, i32 -> vector<8x256xf32>
    %c6 = arith.constant 6 : index
    %c0_24 = arith.constant 0 : index
    %54 = vector.load %arg2[%c6, %c0_24] : memref<9x256xf32, #tpu.memory_space<vmem>>, vector<1x256xf32>
    %55 = vector.broadcast %54 : vector<1x256xf32> to vector<8x256xf32>
    %56 = arith.mulf %53, %55 : vector<8x256xf32>
    %c240_i32 = arith.constant 240 : i32
    %57 = tpu.dynamic_rotate %30 by %c240_i32 dim 1 : vector<8x256xf32>, i32 -> vector<8x256xf32>
    %c7 = arith.constant 7 : index
    %c0_25 = arith.constant 0 : index
    %58 = vector.load %arg2[%c7, %c0_25] : memref<9x256xf32, #tpu.memory_space<vmem>>, vector<1x256xf32>
    %59 = vector.broadcast %58 : vector<1x256xf32> to vector<8x256xf32>
    %60 = arith.mulf %57, %59 : vector<8x256xf32>
    %c239_i32 = arith.constant 239 : i32
    %61 = tpu.dynamic_rotate %30 by %c239_i32 dim 1 : vector<8x256xf32>, i32 -> vector<8x256xf32>
    %c8 = arith.constant 8 : index
    %c0_26 = arith.constant 0 : index
    %62 = vector.load %arg2[%c8, %c0_26] : memref<9x256xf32, #tpu.memory_space<vmem>>, vector<1x256xf32>
    %63 = vector.broadcast %62 : vector<1x256xf32> to vector<8x256xf32>
    %64 = arith.mulf %61, %63 : vector<8x256xf32>
    %65 = tpu.concatenate %36, %40, %44, %48, %30, %52, %56, %60, %64 in 0 : vector<8x256xf32>, vector<8x256xf32>, vector<8x256xf32>, vector<8x256xf32>, vector<8x256xf32>, vector<8x256xf32>, vector<8x256xf32>, vector<8x256xf32>, vector<8x256xf32> -> vector<72x256xf32>
    %66 = arith.truncf %65 : vector<72x256xf32> to vector<72x256xbf16>
    %cst_27 = arith.constant dense<0.000000e+00> : vector<8x256xf32>
    %67 = tpu.matmul %31, %66, %cst_27 {dimension_numbers = #tpu.dot_dimension_numbers<[1], [0], [0], [1], [0, 0, 1, 1], [], []>} : vector<8x72xbf16>, vector<72x256xbf16>, vector<8x256xf32> -> vector<8x256xf32>
    %68 = vector.broadcast %32 : vector<8x1xf32> to vector<8x256xf32>
    %69 = arith.addf %67, %68 : vector<8x256xf32>
    %cst_28 = arith.constant 5.000000e-01 : f32
    %70 = vector.broadcast %cst_28 : f32 to vector<8x256xf32>
    %71 = arith.mulf %70, %69 : vector<8x256xf32>
    %72 = math.tanh %71 : vector<8x256xf32>
    %cst_29 = arith.constant 5.000000e-01 : f32
    %73 = vector.broadcast %cst_29 : f32 to vector<8x256xf32>
    %74 = arith.mulf %73, %72 : vector<8x256xf32>
    %cst_30 = arith.constant 5.000000e-01 : f32
    %75 = vector.broadcast %cst_30 : f32 to vector<8x256xf32>
    %76 = arith.addf %74, %75 : vector<8x256xf32>
    %77 = arith.mulf %69, %76 : vector<8x256xf32>
    %c32 = arith.constant 32 : index
    %c0_31 = arith.constant 0 : index
    %78 = vector.load %arg3[%c32, %c0_31] : memref<144x128xbf16, #tpu.memory_space<vmem>>, vector<8x72xbf16>
    %c32_32 = arith.constant 32 : index
    %c0_33 = arith.constant 0 : index
    %79 = vector.load %arg4[%c32_32, %c0_33] : memref<144x1xf32, #tpu.memory_space<vmem>>, vector<8x1xf32>
    %c17_i32_34 = arith.constant 17 : i32
    %80 = tpu.dynamic_rotate %77 by %c17_i32_34 dim 1 : vector<8x256xf32>, i32 -> vector<8x256xf32>
    %c0_35 = arith.constant 0 : index
    %c0_36 = arith.constant 0 : index
    %81 = vector.load %arg2[%c0_35, %c0_36] : memref<9x256xf32, #tpu.memory_space<vmem>>, vector<1x256xf32>
    %82 = vector.broadcast %81 : vector<1x256xf32> to vector<8x256xf32>
    %83 = arith.mulf %80, %82 : vector<8x256xf32>
    %c16_i32_37 = arith.constant 16 : i32
    %84 = tpu.dynamic_rotate %77 by %c16_i32_37 dim 1 : vector<8x256xf32>, i32 -> vector<8x256xf32>
    %c1_38 = arith.constant 1 : index
    %c0_39 = arith.constant 0 : index
    %85 = vector.load %arg2[%c1_38, %c0_39] : memref<9x256xf32, #tpu.memory_space<vmem>>, vector<1x256xf32>
    %86 = vector.broadcast %85 : vector<1x256xf32> to vector<8x256xf32>
    %87 = arith.mulf %84, %86 : vector<8x256xf32>
    %c15_i32_40 = arith.constant 15 : i32
    %88 = tpu.dynamic_rotate %77 by %c15_i32_40 dim 1 : vector<8x256xf32>, i32 -> vector<8x256xf32>
    %c2_41 = arith.constant 2 : index
    %c0_42 = arith.constant 0 : index
    %89 = vector.load %arg2[%c2_41, %c0_42] : memref<9x256xf32, #tpu.memory_space<vmem>>, vector<1x256xf32>
    %90 = vector.broadcast %89 : vector<1x256xf32> to vector<8x256xf32>
    %91 = arith.mulf %88, %90 : vector<8x256xf32>
    %c1_i32_43 = arith.constant 1 : i32
    %92 = tpu.dynamic_rotate %77 by %c1_i32_43 dim 1 : vector<8x256xf32>, i32 -> vector<8x256xf32>
    %c3_44 = arith.constant 3 : index
    %c0_45 = arith.constant 0 : index
    %93 = vector.load %arg2[%c3_44, %c0_45] : memref<9x256xf32, #tpu.memory_space<vmem>>, vector<1x256xf32>
    %94 = vector.broadcast %93 : vector<1x256xf32> to vector<8x256xf32>
    %95 = arith.mulf %92, %94 : vector<8x256xf32>
    %c255_i32_46 = arith.constant 255 : i32
    %96 = tpu.dynamic_rotate %77 by %c255_i32_46 dim 1 : vector<8x256xf32>, i32 -> vector<8x256xf32>
    %c5_47 = arith.constant 5 : index
    %c0_48 = arith.constant 0 : index
    %97 = vector.load %arg2[%c5_47, %c0_48] : memref<9x256xf32, #tpu.memory_space<vmem>>, vector<1x256xf32>
    %98 = vector.broadcast %97 : vector<1x256xf32> to vector<8x256xf32>
    %99 = arith.mulf %96, %98 : vector<8x256xf32>
    %c241_i32_49 = arith.constant 241 : i32
    %100 = tpu.dynamic_rotate %77 by %c241_i32_49 dim 1 : vector<8x256xf32>, i32 -> vector<8x256xf32>
    %c6_50 = arith.constant 6 : index
    %c0_51 = arith.constant 0 : index
    %101 = vector.load %arg2[%c6_50, %c0_51] : memref<9x256xf32, #tpu.memory_space<vmem>>, vector<1x256xf32>
    %102 = vector.broadcast %101 : vector<1x256xf32> to vector<8x256xf32>
    %103 = arith.mulf %100, %102 : vector<8x256xf32>
    %c240_i32_52 = arith.constant 240 : i32
    %104 = tpu.dynamic_rotate %77 by %c240_i32_52 dim 1 : vector<8x256xf32>, i32 -> vector<8x256xf32>
    %c7_53 = arith.constant 7 : index
    %c0_54 = arith.constant 0 : index
    %105 = vector.load %arg2[%c7_53, %c0_54] : memref<9x256xf32, #tpu.memory_space<vmem>>, vector<1x256xf32>
    %106 = vector.broadcast %105 : vector<1x256xf32> to vector<8x256xf32>
    %107 = arith.mulf %104, %106 : vector<8x256xf32>
    %c239_i32_55 = arith.constant 239 : i32
    %108 = tpu.dynamic_rotate %77 by %c239_i32_55 dim 1 : vector<8x256xf32>, i32 -> vector<8x256xf32>
    %c8_56 = arith.constant 8 : index
    %c0_57 = arith.constant 0 : index
    %109 = vector.load %arg2[%c8_56, %c0_57] : memref<9x256xf32, #tpu.memory_space<vmem>>, vector<1x256xf32>
    %110 = vector.broadcast %109 : vector<1x256xf32> to vector<8x256xf32>
    %111 = arith.mulf %108, %110 : vector<8x256xf32>
    %112 = tpu.concatenate %83, %87, %91, %95, %77, %99, %103, %107, %111 in 0 : vector<8x256xf32>, vector<8x256xf32>, vector<8x256xf32>, vector<8x256xf32>, vector<8x256xf32>, vector<8x256xf32>, vector<8x256xf32>, vector<8x256xf32>, vector<8x256xf32> -> vector<72x256xf32>
    %113 = arith.truncf %112 : vector<72x256xf32> to vector<72x256xbf16>
    %cst_58 = arith.constant dense<0.000000e+00> : vector<8x256xf32>
    %114 = tpu.matmul %78, %113, %cst_58 {dimension_numbers = #tpu.dot_dimension_numbers<[1], [0], [0], [1], [0, 0, 1, 1], [], []>} : vector<8x72xbf16>, vector<72x256xbf16>, vector<8x256xf32> -> vector<8x256xf32>
    %115 = vector.broadcast %79 : vector<8x1xf32> to vector<8x256xf32>
    %116 = arith.addf %114, %115 : vector<8x256xf32>
    %cst_59 = arith.constant 5.000000e-01 : f32
    %117 = vector.broadcast %cst_59 : f32 to vector<8x256xf32>
    %118 = arith.mulf %117, %116 : vector<8x256xf32>
    %119 = math.tanh %118 : vector<8x256xf32>
    %cst_60 = arith.constant 5.000000e-01 : f32
    %120 = vector.broadcast %cst_60 : f32 to vector<8x256xf32>
    %121 = arith.mulf %120, %119 : vector<8x256xf32>
    %cst_61 = arith.constant 5.000000e-01 : f32
    %122 = vector.broadcast %cst_61 : f32 to vector<8x256xf32>
    %123 = arith.addf %121, %122 : vector<8x256xf32>
    %124 = arith.mulf %116, %123 : vector<8x256xf32>
    %125 = arith.addf %30, %124 : vector<8x256xf32>
    %c40 = arith.constant 40 : index
    %c0_62 = arith.constant 0 : index
    %126 = vector.load %arg3[%c40, %c0_62] : memref<144x128xbf16, #tpu.memory_space<vmem>>, vector<8x8xbf16>
    %c40_63 = arith.constant 40 : index
    %c0_64 = arith.constant 0 : index
    %127 = vector.load %arg4[%c40_63, %c0_64] : memref<144x1xf32, #tpu.memory_space<vmem>>, vector<8x1xf32>
    %128 = arith.truncf %16 : vector<8x256xf32> to vector<8x256xbf16>
    %cst_65 = arith.constant dense<0.000000e+00> : vector<8x256xf32>
    %129 = tpu.matmul %126, %128, %cst_65 {dimension_numbers = #tpu.dot_dimension_numbers<[1], [0], [0], [1], [0, 0, 1, 1], [], []>} : vector<8x8xbf16>, vector<8x256xbf16>, vector<8x256xf32> -> vector<8x256xf32>
    %130 = vector.broadcast %127 : vector<8x1xf32> to vector<8x256xf32>
    %131 = arith.addf %129, %130 : vector<8x256xf32>
    %cst_66 = arith.constant 5.000000e-01 : f32
    %132 = vector.broadcast %cst_66 : f32 to vector<8x256xf32>
    %133 = arith.mulf %132, %131 : vector<8x256xf32>
    %134 = math.tanh %133 : vector<8x256xf32>
    %cst_67 = arith.constant 5.000000e-01 : f32
    %135 = vector.broadcast %cst_67 : f32 to vector<8x256xf32>
    %136 = arith.mulf %135, %134 : vector<8x256xf32>
    %cst_68 = arith.constant 5.000000e-01 : f32
    %137 = vector.broadcast %cst_68 : f32 to vector<8x256xf32>
    %138 = arith.addf %136, %137 : vector<8x256xf32>
    %139 = arith.mulf %131, %138 : vector<8x256xf32>
    %140 = tpu.concatenate %125, %139 in 0 : vector<8x256xf32>, vector<8x256xf32> -> vector<16x256xf32>
    %c48 = arith.constant 48 : index
    %c0_69 = arith.constant 0 : index
    %141 = vector.load %arg3[%c48, %c0_69] : memref<144x128xbf16, #tpu.memory_space<vmem>>, vector<8x16xbf16>
    %c48_70 = arith.constant 48 : index
    %c0_71 = arith.constant 0 : index
    %142 = vector.load %arg4[%c48_70, %c0_71] : memref<144x1xf32, #tpu.memory_space<vmem>>, vector<8x1xf32>
    %143 = arith.truncf %140 : vector<16x256xf32> to vector<16x256xbf16>
    %cst_72 = arith.constant dense<0.000000e+00> : vector<8x256xf32>
    %144 = tpu.matmul %141, %143, %cst_72 {dimension_numbers = #tpu.dot_dimension_numbers<[1], [0], [0], [1], [0, 0, 1, 1], [], []>} : vector<8x16xbf16>, vector<16x256xbf16>, vector<8x256xf32> -> vector<8x256xf32>
    %145 = vector.broadcast %142 : vector<8x1xf32> to vector<8x256xf32>
    %146 = arith.addf %144, %145 : vector<8x256xf32>
    %cst_73 = arith.constant 5.000000e-01 : f32
    %147 = vector.broadcast %cst_73 : f32 to vector<8x256xf32>
    %148 = arith.mulf %147, %146 : vector<8x256xf32>
    %149 = math.tanh %148 : vector<8x256xf32>
    %cst_74 = arith.constant 5.000000e-01 : f32
    %150 = vector.broadcast %cst_74 : f32 to vector<8x256xf32>
    %151 = arith.mulf %150, %149 : vector<8x256xf32>
    %cst_75 = arith.constant 5.000000e-01 : f32
    %152 = vector.broadcast %cst_75 : f32 to vector<8x256xf32>
    %153 = arith.addf %151, %152 : vector<8x256xf32>
    %154 = arith.mulf %146, %153 : vector<8x256xf32>
    %c56 = arith.constant 56 : index
    %c0_76 = arith.constant 0 : index
    %155 = vector.load %arg3[%c56, %c0_76] : memref<144x128xbf16, #tpu.memory_space<vmem>>, vector<8x72xbf16>
    %c56_77 = arith.constant 56 : index
    %c0_78 = arith.constant 0 : index
    %156 = vector.load %arg4[%c56_77, %c0_78] : memref<144x1xf32, #tpu.memory_space<vmem>>, vector<8x1xf32>
    %c17_i32_79 = arith.constant 17 : i32
    %157 = tpu.dynamic_rotate %154 by %c17_i32_79 dim 1 : vector<8x256xf32>, i32 -> vector<8x256xf32>
    %c0_80 = arith.constant 0 : index
    %c0_81 = arith.constant 0 : index
    %158 = vector.load %arg2[%c0_80, %c0_81] : memref<9x256xf32, #tpu.memory_space<vmem>>, vector<1x256xf32>
    %159 = vector.broadcast %158 : vector<1x256xf32> to vector<8x256xf32>
    %160 = arith.mulf %157, %159 : vector<8x256xf32>
    %c16_i32_82 = arith.constant 16 : i32
    %161 = tpu.dynamic_rotate %154 by %c16_i32_82 dim 1 : vector<8x256xf32>, i32 -> vector<8x256xf32>
    %c1_83 = arith.constant 1 : index
    %c0_84 = arith.constant 0 : index
    %162 = vector.load %arg2[%c1_83, %c0_84] : memref<9x256xf32, #tpu.memory_space<vmem>>, vector<1x256xf32>
    %163 = vector.broadcast %162 : vector<1x256xf32> to vector<8x256xf32>
    %164 = arith.mulf %161, %163 : vector<8x256xf32>
    %c15_i32_85 = arith.constant 15 : i32
    %165 = tpu.dynamic_rotate %154 by %c15_i32_85 dim 1 : vector<8x256xf32>, i32 -> vector<8x256xf32>
    %c2_86 = arith.constant 2 : index
    %c0_87 = arith.constant 0 : index
    %166 = vector.load %arg2[%c2_86, %c0_87] : memref<9x256xf32, #tpu.memory_space<vmem>>, vector<1x256xf32>
    %167 = vector.broadcast %166 : vector<1x256xf32> to vector<8x256xf32>
    %168 = arith.mulf %165, %167 : vector<8x256xf32>
    %c1_i32_88 = arith.constant 1 : i32
    %169 = tpu.dynamic_rotate %154 by %c1_i32_88 dim 1 : vector<8x256xf32>, i32 -> vector<8x256xf32>
    %c3_89 = arith.constant 3 : index
    %c0_90 = arith.constant 0 : index
    %170 = vector.load %arg2[%c3_89, %c0_90] : memref<9x256xf32, #tpu.memory_space<vmem>>, vector<1x256xf32>
    %171 = vector.broadcast %170 : vector<1x256xf32> to vector<8x256xf32>
    %172 = arith.mulf %169, %171 : vector<8x256xf32>
    %c255_i32_91 = arith.constant 255 : i32
    %173 = tpu.dynamic_rotate %154 by %c255_i32_91 dim 1 : vector<8x256xf32>, i32 -> vector<8x256xf32>
    %c5_92 = arith.constant 5 : index
    %c0_93 = arith.constant 0 : index
    %174 = vector.load %arg2[%c5_92, %c0_93] : memref<9x256xf32, #tpu.memory_space<vmem>>, vector<1x256xf32>
    %175 = vector.broadcast %174 : vector<1x256xf32> to vector<8x256xf32>
    %176 = arith.mulf %173, %175 : vector<8x256xf32>
    %c241_i32_94 = arith.constant 241 : i32
    %177 = tpu.dynamic_rotate %154 by %c241_i32_94 dim 1 : vector<8x256xf32>, i32 -> vector<8x256xf32>
    %c6_95 = arith.constant 6 : index
    %c0_96 = arith.constant 0 : index
    %178 = vector.load %arg2[%c6_95, %c0_96] : memref<9x256xf32, #tpu.memory_space<vmem>>, vector<1x256xf32>
    %179 = vector.broadcast %178 : vector<1x256xf32> to vector<8x256xf32>
    %180 = arith.mulf %177, %179 : vector<8x256xf32>
    %c240_i32_97 = arith.constant 240 : i32
    %181 = tpu.dynamic_rotate %154 by %c240_i32_97 dim 1 : vector<8x256xf32>, i32 -> vector<8x256xf32>
    %c7_98 = arith.constant 7 : index
    %c0_99 = arith.constant 0 : index
    %182 = vector.load %arg2[%c7_98, %c0_99] : memref<9x256xf32, #tpu.memory_space<vmem>>, vector<1x256xf32>
    %183 = vector.broadcast %182 : vector<1x256xf32> to vector<8x256xf32>
    %184 = arith.mulf %181, %183 : vector<8x256xf32>
    %c239_i32_100 = arith.constant 239 : i32
    %185 = tpu.dynamic_rotate %154 by %c239_i32_100 dim 1 : vector<8x256xf32>, i32 -> vector<8x256xf32>
    %c8_101 = arith.constant 8 : index
    %c0_102 = arith.constant 0 : index
    %186 = vector.load %arg2[%c8_101, %c0_102] : memref<9x256xf32, #tpu.memory_space<vmem>>, vector<1x256xf32>
    %187 = vector.broadcast %186 : vector<1x256xf32> to vector<8x256xf32>
    %188 = arith.mulf %185, %187 : vector<8x256xf32>
    %189 = tpu.concatenate %160, %164, %168, %172, %154, %176, %180, %184, %188 in 0 : vector<8x256xf32>, vector<8x256xf32>, vector<8x256xf32>, vector<8x256xf32>, vector<8x256xf32>, vector<8x256xf32>, vector<8x256xf32>, vector<8x256xf32>, vector<8x256xf32> -> vector<72x256xf32>
    %190 = arith.truncf %189 : vector<72x256xf32> to vector<72x256xbf16>
    %cst_103 = arith.constant dense<0.000000e+00> : vector<8x256xf32>
    %191 = tpu.matmul %155, %190, %cst_103 {dimension_numbers = #tpu.dot_dimension_numbers<[1], [0], [0], [1], [0, 0, 1, 1], [], []>} : vector<8x72xbf16>, vector<72x256xbf16>, vector<8x256xf32> -> vector<8x256xf32>
    %192 = vector.broadcast %156 : vector<8x1xf32> to vector<8x256xf32>
    %193 = arith.addf %191, %192 : vector<8x256xf32>
    %cst_104 = arith.constant 5.000000e-01 : f32
    %194 = vector.broadcast %cst_104 : f32 to vector<8x256xf32>
    %195 = arith.mulf %194, %193 : vector<8x256xf32>
    %196 = math.tanh %195 : vector<8x256xf32>
    %cst_105 = arith.constant 5.000000e-01 : f32
    %197 = vector.broadcast %cst_105 : f32 to vector<8x256xf32>
    %198 = arith.mulf %197, %196 : vector<8x256xf32>
    %cst_106 = arith.constant 5.000000e-01 : f32
    %199 = vector.broadcast %cst_106 : f32 to vector<8x256xf32>
    %200 = arith.addf %198, %199 : vector<8x256xf32>
    %201 = arith.mulf %193, %200 : vector<8x256xf32>
    %c64 = arith.constant 64 : index
    %c0_107 = arith.constant 0 : index
    %202 = vector.load %arg3[%c64, %c0_107] : memref<144x128xbf16, #tpu.memory_space<vmem>>, vector<8x8xbf16>
    %c64_108 = arith.constant 64 : index
    %c0_109 = arith.constant 0 : index
    %203 = vector.load %arg4[%c64_108, %c0_109] : memref<144x1xf32, #tpu.memory_space<vmem>>, vector<8x1xf32>
    %204 = arith.truncf %201 : vector<8x256xf32> to vector<8x256xbf16>
    %cst_110 = arith.constant dense<0.000000e+00> : vector<8x256xf32>
    %205 = tpu.matmul %202, %204, %cst_110 {dimension_numbers = #tpu.dot_dimension_numbers<[1], [0], [0], [1], [0, 0, 1, 1], [], []>} : vector<8x8xbf16>, vector<8x256xbf16>, vector<8x256xf32> -> vector<8x256xf32>
    %206 = vector.broadcast %203 : vector<8x1xf32> to vector<8x256xf32>
    %207 = arith.addf %205, %206 : vector<8x256xf32>
    %cst_111 = arith.constant 5.000000e-01 : f32
    %208 = vector.broadcast %cst_111 : f32 to vector<8x256xf32>
    %209 = arith.mulf %208, %207 : vector<8x256xf32>
    %210 = math.tanh %209 : vector<8x256xf32>
    %cst_112 = arith.constant 5.000000e-01 : f32
    %211 = vector.broadcast %cst_112 : f32 to vector<8x256xf32>
    %212 = arith.mulf %211, %210 : vector<8x256xf32>
    %cst_113 = arith.constant 5.000000e-01 : f32
    %213 = vector.broadcast %cst_113 : f32 to vector<8x256xf32>
    %214 = arith.addf %212, %213 : vector<8x256xf32>
    %215 = arith.mulf %207, %214 : vector<8x256xf32>
    %c72 = arith.constant 72 : index
    %c0_114 = arith.constant 0 : index
    %216 = vector.load %arg3[%c72, %c0_114] : memref<144x128xbf16, #tpu.memory_space<vmem>>, vector<8x72xbf16>
    %c72_115 = arith.constant 72 : index
    %c0_116 = arith.constant 0 : index
    %217 = vector.load %arg4[%c72_115, %c0_116] : memref<144x1xf32, #tpu.memory_space<vmem>>, vector<8x1xf32>
    %c17_i32_117 = arith.constant 17 : i32
    %218 = tpu.dynamic_rotate %215 by %c17_i32_117 dim 1 : vector<8x256xf32>, i32 -> vector<8x256xf32>
    %c0_118 = arith.constant 0 : index
    %c0_119 = arith.constant 0 : index
    %219 = vector.load %arg2[%c0_118, %c0_119] : memref<9x256xf32, #tpu.memory_space<vmem>>, vector<1x256xf32>
    %220 = vector.broadcast %219 : vector<1x256xf32> to vector<8x256xf32>
    %221 = arith.mulf %218, %220 : vector<8x256xf32>
    %c16_i32_120 = arith.constant 16 : i32
    %222 = tpu.dynamic_rotate %215 by %c16_i32_120 dim 1 : vector<8x256xf32>, i32 -> vector<8x256xf32>
    %c1_121 = arith.constant 1 : index
    %c0_122 = arith.constant 0 : index
    %223 = vector.load %arg2[%c1_121, %c0_122] : memref<9x256xf32, #tpu.memory_space<vmem>>, vector<1x256xf32>
    %224 = vector.broadcast %223 : vector<1x256xf32> to vector<8x256xf32>
    %225 = arith.mulf %222, %224 : vector<8x256xf32>
    %c15_i32_123 = arith.constant 15 : i32
    %226 = tpu.dynamic_rotate %215 by %c15_i32_123 dim 1 : vector<8x256xf32>, i32 -> vector<8x256xf32>
    %c2_124 = arith.constant 2 : index
    %c0_125 = arith.constant 0 : index
    %227 = vector.load %arg2[%c2_124, %c0_125] : memref<9x256xf32, #tpu.memory_space<vmem>>, vector<1x256xf32>
    %228 = vector.broadcast %227 : vector<1x256xf32> to vector<8x256xf32>
    %229 = arith.mulf %226, %228 : vector<8x256xf32>
    %c1_i32_126 = arith.constant 1 : i32
    %230 = tpu.dynamic_rotate %215 by %c1_i32_126 dim 1 : vector<8x256xf32>, i32 -> vector<8x256xf32>
    %c3_127 = arith.constant 3 : index
    %c0_128 = arith.constant 0 : index
    %231 = vector.load %arg2[%c3_127, %c0_128] : memref<9x256xf32, #tpu.memory_space<vmem>>, vector<1x256xf32>
    %232 = vector.broadcast %231 : vector<1x256xf32> to vector<8x256xf32>
    %233 = arith.mulf %230, %232 : vector<8x256xf32>
    %c255_i32_129 = arith.constant 255 : i32
    %234 = tpu.dynamic_rotate %215 by %c255_i32_129 dim 1 : vector<8x256xf32>, i32 -> vector<8x256xf32>
    %c5_130 = arith.constant 5 : index
    %c0_131 = arith.constant 0 : index
    %235 = vector.load %arg2[%c5_130, %c0_131] : memref<9x256xf32, #tpu.memory_space<vmem>>, vector<1x256xf32>
    %236 = vector.broadcast %235 : vector<1x256xf32> to vector<8x256xf32>
    %237 = arith.mulf %234, %236 : vector<8x256xf32>
    %c241_i32_132 = arith.constant 241 : i32
    %238 = tpu.dynamic_rotate %215 by %c241_i32_132 dim 1 : vector<8x256xf32>, i32 -> vector<8x256xf32>
    %c6_133 = arith.constant 6 : index
    %c0_134 = arith.constant 0 : index
    %239 = vector.load %arg2[%c6_133, %c0_134] : memref<9x256xf32, #tpu.memory_space<vmem>>, vector<1x256xf32>
    %240 = vector.broadcast %239 : vector<1x256xf32> to vector<8x256xf32>
    %241 = arith.mulf %238, %240 : vector<8x256xf32>
    %c240_i32_135 = arith.constant 240 : i32
    %242 = tpu.dynamic_rotate %215 by %c240_i32_135 dim 1 : vector<8x256xf32>, i32 -> vector<8x256xf32>
    %c7_136 = arith.constant 7 : index
    %c0_137 = arith.constant 0 : index
    %243 = vector.load %arg2[%c7_136, %c0_137] : memref<9x256xf32, #tpu.memory_space<vmem>>, vector<1x256xf32>
    %244 = vector.broadcast %243 : vector<1x256xf32> to vector<8x256xf32>
    %245 = arith.mulf %242, %244 : vector<8x256xf32>
    %c239_i32_138 = arith.constant 239 : i32
    %246 = tpu.dynamic_rotate %215 by %c239_i32_138 dim 1 : vector<8x256xf32>, i32 -> vector<8x256xf32>
    %c8_139 = arith.constant 8 : index
    %c0_140 = arith.constant 0 : index
    %247 = vector.load %arg2[%c8_139, %c0_140] : memref<9x256xf32, #tpu.memory_space<vmem>>, vector<1x256xf32>
    %248 = vector.broadcast %247 : vector<1x256xf32> to vector<8x256xf32>
    %249 = arith.mulf %246, %248 : vector<8x256xf32>
    %250 = tpu.concatenate %221, %225, %229, %233, %215, %237, %241, %245, %249 in 0 : vector<8x256xf32>, vector<8x256xf32>, vector<8x256xf32>, vector<8x256xf32>, vector<8x256xf32>, vector<8x256xf32>, vector<8x256xf32>, vector<8x256xf32>, vector<8x256xf32> -> vector<72x256xf32>
    %251 = arith.truncf %250 : vector<72x256xf32> to vector<72x256xbf16>
    %cst_141 = arith.constant dense<0.000000e+00> : vector<8x256xf32>
    %252 = tpu.matmul %216, %251, %cst_141 {dimension_numbers = #tpu.dot_dimension_numbers<[1], [0], [0], [1], [0, 0, 1, 1], [], []>} : vector<8x72xbf16>, vector<72x256xbf16>, vector<8x256xf32> -> vector<8x256xf32>
    %253 = vector.broadcast %217 : vector<8x1xf32> to vector<8x256xf32>
    %254 = arith.addf %252, %253 : vector<8x256xf32>
    %cst_142 = arith.constant 5.000000e-01 : f32
    %255 = vector.broadcast %cst_142 : f32 to vector<8x256xf32>
    %256 = arith.mulf %255, %254 : vector<8x256xf32>
    %257 = math.tanh %256 : vector<8x256xf32>
    %cst_143 = arith.constant 5.000000e-01 : f32
    %258 = vector.broadcast %cst_143 : f32 to vector<8x256xf32>
    %259 = arith.mulf %258, %257 : vector<8x256xf32>
    %cst_144 = arith.constant 5.000000e-01 : f32
    %260 = vector.broadcast %cst_144 : f32 to vector<8x256xf32>
    %261 = arith.addf %259, %260 : vector<8x256xf32>
    %262 = arith.mulf %254, %261 : vector<8x256xf32>
    %c80 = arith.constant 80 : index
    %c0_145 = arith.constant 0 : index
    %263 = vector.load %arg3[%c80, %c0_145] : memref<144x128xbf16, #tpu.memory_space<vmem>>, vector<8x72xbf16>
    %c80_146 = arith.constant 80 : index
    %c0_147 = arith.constant 0 : index
    %264 = vector.load %arg4[%c80_146, %c0_147] : memref<144x1xf32, #tpu.memory_space<vmem>>, vector<8x1xf32>
    %c17_i32_148 = arith.constant 17 : i32
    %265 = tpu.dynamic_rotate %262 by %c17_i32_148 dim 1 : vector<8x256xf32>, i32 -> vector<8x256xf32>
    %c0_149 = arith.constant 0 : index
    %c0_150 = arith.constant 0 : index
    %266 = vector.load %arg2[%c0_149, %c0_150] : memref<9x256xf32, #tpu.memory_space<vmem>>, vector<1x256xf32>
    %267 = vector.broadcast %266 : vector<1x256xf32> to vector<8x256xf32>
    %268 = arith.mulf %265, %267 : vector<8x256xf32>
    %c16_i32_151 = arith.constant 16 : i32
    %269 = tpu.dynamic_rotate %262 by %c16_i32_151 dim 1 : vector<8x256xf32>, i32 -> vector<8x256xf32>
    %c1_152 = arith.constant 1 : index
    %c0_153 = arith.constant 0 : index
    %270 = vector.load %arg2[%c1_152, %c0_153] : memref<9x256xf32, #tpu.memory_space<vmem>>, vector<1x256xf32>
    %271 = vector.broadcast %270 : vector<1x256xf32> to vector<8x256xf32>
    %272 = arith.mulf %269, %271 : vector<8x256xf32>
    %c15_i32_154 = arith.constant 15 : i32
    %273 = tpu.dynamic_rotate %262 by %c15_i32_154 dim 1 : vector<8x256xf32>, i32 -> vector<8x256xf32>
    %c2_155 = arith.constant 2 : index
    %c0_156 = arith.constant 0 : index
    %274 = vector.load %arg2[%c2_155, %c0_156] : memref<9x256xf32, #tpu.memory_space<vmem>>, vector<1x256xf32>
    %275 = vector.broadcast %274 : vector<1x256xf32> to vector<8x256xf32>
    %276 = arith.mulf %273, %275 : vector<8x256xf32>
    %c1_i32_157 = arith.constant 1 : i32
    %277 = tpu.dynamic_rotate %262 by %c1_i32_157 dim 1 : vector<8x256xf32>, i32 -> vector<8x256xf32>
    %c3_158 = arith.constant 3 : index
    %c0_159 = arith.constant 0 : index
    %278 = vector.load %arg2[%c3_158, %c0_159] : memref<9x256xf32, #tpu.memory_space<vmem>>, vector<1x256xf32>
    %279 = vector.broadcast %278 : vector<1x256xf32> to vector<8x256xf32>
    %280 = arith.mulf %277, %279 : vector<8x256xf32>
    %c255_i32_160 = arith.constant 255 : i32
    %281 = tpu.dynamic_rotate %262 by %c255_i32_160 dim 1 : vector<8x256xf32>, i32 -> vector<8x256xf32>
    %c5_161 = arith.constant 5 : index
    %c0_162 = arith.constant 0 : index
    %282 = vector.load %arg2[%c5_161, %c0_162] : memref<9x256xf32, #tpu.memory_space<vmem>>, vector<1x256xf32>
    %283 = vector.broadcast %282 : vector<1x256xf32> to vector<8x256xf32>
    %284 = arith.mulf %281, %283 : vector<8x256xf32>
    %c241_i32_163 = arith.constant 241 : i32
    %285 = tpu.dynamic_rotate %262 by %c241_i32_163 dim 1 : vector<8x256xf32>, i32 -> vector<8x256xf32>
    %c6_164 = arith.constant 6 : index
    %c0_165 = arith.constant 0 : index
    %286 = vector.load %arg2[%c6_164, %c0_165] : memref<9x256xf32, #tpu.memory_space<vmem>>, vector<1x256xf32>
    %287 = vector.broadcast %286 : vector<1x256xf32> to vector<8x256xf32>
    %288 = arith.mulf %285, %287 : vector<8x256xf32>
    %c240_i32_166 = arith.constant 240 : i32
    %289 = tpu.dynamic_rotate %262 by %c240_i32_166 dim 1 : vector<8x256xf32>, i32 -> vector<8x256xf32>
    %c7_167 = arith.constant 7 : index
    %c0_168 = arith.constant 0 : index
    %290 = vector.load %arg2[%c7_167, %c0_168] : memref<9x256xf32, #tpu.memory_space<vmem>>, vector<1x256xf32>
    %291 = vector.broadcast %290 : vector<1x256xf32> to vector<8x256xf32>
    %292 = arith.mulf %289, %291 : vector<8x256xf32>
    %c239_i32_169 = arith.constant 239 : i32
    %293 = tpu.dynamic_rotate %262 by %c239_i32_169 dim 1 : vector<8x256xf32>, i32 -> vector<8x256xf32>
    %c8_170 = arith.constant 8 : index
    %c0_171 = arith.constant 0 : index
    %294 = vector.load %arg2[%c8_170, %c0_171] : memref<9x256xf32, #tpu.memory_space<vmem>>, vector<1x256xf32>
    %295 = vector.broadcast %294 : vector<1x256xf32> to vector<8x256xf32>
    %296 = arith.mulf %293, %295 : vector<8x256xf32>
    %297 = tpu.concatenate %268, %272, %276, %280, %262, %284, %288, %292, %296 in 0 : vector<8x256xf32>, vector<8x256xf32>, vector<8x256xf32>, vector<8x256xf32>, vector<8x256xf32>, vector<8x256xf32>, vector<8x256xf32>, vector<8x256xf32>, vector<8x256xf32> -> vector<72x256xf32>
    %298 = arith.truncf %297 : vector<72x256xf32> to vector<72x256xbf16>
    %cst_172 = arith.constant dense<0.000000e+00> : vector<8x256xf32>
    %299 = tpu.matmul %263, %298, %cst_172 {dimension_numbers = #tpu.dot_dimension_numbers<[1], [0], [0], [1], [0, 0, 1, 1], [], []>} : vector<8x72xbf16>, vector<72x256xbf16>, vector<8x256xf32> -> vector<8x256xf32>
    %300 = vector.broadcast %264 : vector<8x1xf32> to vector<8x256xf32>
    %301 = arith.addf %299, %300 : vector<8x256xf32>
    %cst_173 = arith.constant 5.000000e-01 : f32
    %302 = vector.broadcast %cst_173 : f32 to vector<8x256xf32>
    %303 = arith.mulf %302, %301 : vector<8x256xf32>
    %304 = math.tanh %303 : vector<8x256xf32>
    %cst_174 = arith.constant 5.000000e-01 : f32
    %305 = vector.broadcast %cst_174 : f32 to vector<8x256xf32>
    %306 = arith.mulf %305, %304 : vector<8x256xf32>
    %cst_175 = arith.constant 5.000000e-01 : f32
    %307 = vector.broadcast %cst_175 : f32 to vector<8x256xf32>
    %308 = arith.addf %306, %307 : vector<8x256xf32>
    %309 = arith.mulf %301, %308 : vector<8x256xf32>
    %310 = arith.addf %215, %309 : vector<8x256xf32>
    %c88 = arith.constant 88 : index
    %c0_176 = arith.constant 0 : index
    %311 = vector.load %arg3[%c88, %c0_176] : memref<144x128xbf16, #tpu.memory_space<vmem>>, vector<8x8xbf16>
    %c88_177 = arith.constant 88 : index
    %c0_178 = arith.constant 0 : index
    %312 = vector.load %arg4[%c88_177, %c0_178] : memref<144x1xf32, #tpu.memory_space<vmem>>, vector<8x1xf32>
    %313 = arith.truncf %201 : vector<8x256xf32> to vector<8x256xbf16>
    %cst_179 = arith.constant dense<0.000000e+00> : vector<8x256xf32>
    %314 = tpu.matmul %311, %313, %cst_179 {dimension_numbers = #tpu.dot_dimension_numbers<[1], [0], [0], [1], [0, 0, 1, 1], [], []>} : vector<8x8xbf16>, vector<8x256xbf16>, vector<8x256xf32> -> vector<8x256xf32>
    %315 = vector.broadcast %312 : vector<8x1xf32> to vector<8x256xf32>
    %316 = arith.addf %314, %315 : vector<8x256xf32>
    %cst_180 = arith.constant 5.000000e-01 : f32
    %317 = vector.broadcast %cst_180 : f32 to vector<8x256xf32>
    %318 = arith.mulf %317, %316 : vector<8x256xf32>
    %319 = math.tanh %318 : vector<8x256xf32>
    %cst_181 = arith.constant 5.000000e-01 : f32
    %320 = vector.broadcast %cst_181 : f32 to vector<8x256xf32>
    %321 = arith.mulf %320, %319 : vector<8x256xf32>
    %cst_182 = arith.constant 5.000000e-01 : f32
    %322 = vector.broadcast %cst_182 : f32 to vector<8x256xf32>
    %323 = arith.addf %321, %322 : vector<8x256xf32>
    %324 = arith.mulf %316, %323 : vector<8x256xf32>
    %325 = tpu.concatenate %310, %324 in 0 : vector<8x256xf32>, vector<8x256xf32> -> vector<16x256xf32>
    %c96 = arith.constant 96 : index
    %c0_183 = arith.constant 0 : index
    %326 = vector.load %arg3[%c96, %c0_183] : memref<144x128xbf16, #tpu.memory_space<vmem>>, vector<8x16xbf16>
    %c96_184 = arith.constant 96 : index
    %c0_185 = arith.constant 0 : index
    %327 = vector.load %arg4[%c96_184, %c0_185] : memref<144x1xf32, #tpu.memory_space<vmem>>, vector<8x1xf32>
    %328 = arith.truncf %325 : vector<16x256xf32> to vector<16x256xbf16>
    %cst_186 = arith.constant dense<0.000000e+00> : vector<8x256xf32>
    %329 = tpu.matmul %326, %328, %cst_186 {dimension_numbers = #tpu.dot_dimension_numbers<[1], [0], [0], [1], [0, 0, 1, 1], [], []>} : vector<8x16xbf16>, vector<16x256xbf16>, vector<8x256xf32> -> vector<8x256xf32>
    %330 = vector.broadcast %327 : vector<8x1xf32> to vector<8x256xf32>
    %331 = arith.addf %329, %330 : vector<8x256xf32>
    %cst_187 = arith.constant 5.000000e-01 : f32
    %332 = vector.broadcast %cst_187 : f32 to vector<8x256xf32>
    %333 = arith.mulf %332, %331 : vector<8x256xf32>
    %334 = math.tanh %333 : vector<8x256xf32>
    %cst_188 = arith.constant 5.000000e-01 : f32
    %335 = vector.broadcast %cst_188 : f32 to vector<8x256xf32>
    %336 = arith.mulf %335, %334 : vector<8x256xf32>
    %cst_189 = arith.constant 5.000000e-01 : f32
    %337 = vector.broadcast %cst_189 : f32 to vector<8x256xf32>
    %338 = arith.addf %336, %337 : vector<8x256xf32>
    %339 = arith.mulf %331, %338 : vector<8x256xf32>
    %c104 = arith.constant 104 : index
    %c0_190 = arith.constant 0 : index
    %340 = vector.load %arg3[%c104, %c0_190] : memref<144x128xbf16, #tpu.memory_space<vmem>>, vector<8x72xbf16>
    %c104_191 = arith.constant 104 : index
    %c0_192 = arith.constant 0 : index
    %341 = vector.load %arg4[%c104_191, %c0_192] : memref<144x1xf32, #tpu.memory_space<vmem>>, vector<8x1xf32>
    %c17_i32_193 = arith.constant 17 : i32
    %342 = tpu.dynamic_rotate %339 by %c17_i32_193 dim 1 : vector<8x256xf32>, i32 -> vector<8x256xf32>
    %c0_194 = arith.constant 0 : index
    %c0_195 = arith.constant 0 : index
    %343 = vector.load %arg2[%c0_194, %c0_195] : memref<9x256xf32, #tpu.memory_space<vmem>>, vector<1x256xf32>
    %344 = vector.broadcast %343 : vector<1x256xf32> to vector<8x256xf32>
    %345 = arith.mulf %342, %344 : vector<8x256xf32>
    %c16_i32_196 = arith.constant 16 : i32
    %346 = tpu.dynamic_rotate %339 by %c16_i32_196 dim 1 : vector<8x256xf32>, i32 -> vector<8x256xf32>
    %c1_197 = arith.constant 1 : index
    %c0_198 = arith.constant 0 : index
    %347 = vector.load %arg2[%c1_197, %c0_198] : memref<9x256xf32, #tpu.memory_space<vmem>>, vector<1x256xf32>
    %348 = vector.broadcast %347 : vector<1x256xf32> to vector<8x256xf32>
    %349 = arith.mulf %346, %348 : vector<8x256xf32>
    %c15_i32_199 = arith.constant 15 : i32
    %350 = tpu.dynamic_rotate %339 by %c15_i32_199 dim 1 : vector<8x256xf32>, i32 -> vector<8x256xf32>
    %c2_200 = arith.constant 2 : index
    %c0_201 = arith.constant 0 : index
    %351 = vector.load %arg2[%c2_200, %c0_201] : memref<9x256xf32, #tpu.memory_space<vmem>>, vector<1x256xf32>
    %352 = vector.broadcast %351 : vector<1x256xf32> to vector<8x256xf32>
    %353 = arith.mulf %350, %352 : vector<8x256xf32>
    %c1_i32_202 = arith.constant 1 : i32
    %354 = tpu.dynamic_rotate %339 by %c1_i32_202 dim 1 : vector<8x256xf32>, i32 -> vector<8x256xf32>
    %c3_203 = arith.constant 3 : index
    %c0_204 = arith.constant 0 : index
    %355 = vector.load %arg2[%c3_203, %c0_204] : memref<9x256xf32, #tpu.memory_space<vmem>>, vector<1x256xf32>
    %356 = vector.broadcast %355 : vector<1x256xf32> to vector<8x256xf32>
    %357 = arith.mulf %354, %356 : vector<8x256xf32>
    %c255_i32_205 = arith.constant 255 : i32
    %358 = tpu.dynamic_rotate %339 by %c255_i32_205 dim 1 : vector<8x256xf32>, i32 -> vector<8x256xf32>
    %c5_206 = arith.constant 5 : index
    %c0_207 = arith.constant 0 : index
    %359 = vector.load %arg2[%c5_206, %c0_207] : memref<9x256xf32, #tpu.memory_space<vmem>>, vector<1x256xf32>
    %360 = vector.broadcast %359 : vector<1x256xf32> to vector<8x256xf32>
    %361 = arith.mulf %358, %360 : vector<8x256xf32>
    %c241_i32_208 = arith.constant 241 : i32
    %362 = tpu.dynamic_rotate %339 by %c241_i32_208 dim 1 : vector<8x256xf32>, i32 -> vector<8x256xf32>
    %c6_209 = arith.constant 6 : index
    %c0_210 = arith.constant 0 : index
    %363 = vector.load %arg2[%c6_209, %c0_210] : memref<9x256xf32, #tpu.memory_space<vmem>>, vector<1x256xf32>
    %364 = vector.broadcast %363 : vector<1x256xf32> to vector<8x256xf32>
    %365 = arith.mulf %362, %364 : vector<8x256xf32>
    %c240_i32_211 = arith.constant 240 : i32
    %366 = tpu.dynamic_rotate %339 by %c240_i32_211 dim 1 : vector<8x256xf32>, i32 -> vector<8x256xf32>
    %c7_212 = arith.constant 7 : index
    %c0_213 = arith.constant 0 : index
    %367 = vector.load %arg2[%c7_212, %c0_213] : memref<9x256xf32, #tpu.memory_space<vmem>>, vector<1x256xf32>
    %368 = vector.broadcast %367 : vector<1x256xf32> to vector<8x256xf32>
    %369 = arith.mulf %366, %368 : vector<8x256xf32>
    %c239_i32_214 = arith.constant 239 : i32
    %370 = tpu.dynamic_rotate %339 by %c239_i32_214 dim 1 : vector<8x256xf32>, i32 -> vector<8x256xf32>
    %c8_215 = arith.constant 8 : index
    %c0_216 = arith.constant 0 : index
    %371 = vector.load %arg2[%c8_215, %c0_216] : memref<9x256xf32, #tpu.memory_space<vmem>>, vector<1x256xf32>
    %372 = vector.broadcast %371 : vector<1x256xf32> to vector<8x256xf32>
    %373 = arith.mulf %370, %372 : vector<8x256xf32>
    %374 = tpu.concatenate %345, %349, %353, %357, %339, %361, %365, %369, %373 in 0 : vector<8x256xf32>, vector<8x256xf32>, vector<8x256xf32>, vector<8x256xf32>, vector<8x256xf32>, vector<8x256xf32>, vector<8x256xf32>, vector<8x256xf32>, vector<8x256xf32> -> vector<72x256xf32>
    %375 = arith.truncf %374 : vector<72x256xf32> to vector<72x256xbf16>
    %cst_217 = arith.constant dense<0.000000e+00> : vector<8x256xf32>
    %376 = tpu.matmul %340, %375, %cst_217 {dimension_numbers = #tpu.dot_dimension_numbers<[1], [0], [0], [1], [0, 0, 1, 1], [], []>} : vector<8x72xbf16>, vector<72x256xbf16>, vector<8x256xf32> -> vector<8x256xf32>
    %377 = vector.broadcast %341 : vector<8x1xf32> to vector<8x256xf32>
    %378 = arith.addf %376, %377 : vector<8x256xf32>
    %cst_218 = arith.constant 5.000000e-01 : f32
    %379 = vector.broadcast %cst_218 : f32 to vector<8x256xf32>
    %380 = arith.mulf %379, %378 : vector<8x256xf32>
    %381 = math.tanh %380 : vector<8x256xf32>
    %cst_219 = arith.constant 5.000000e-01 : f32
    %382 = vector.broadcast %cst_219 : f32 to vector<8x256xf32>
    %383 = arith.mulf %382, %381 : vector<8x256xf32>
    %cst_220 = arith.constant 5.000000e-01 : f32
    %384 = vector.broadcast %cst_220 : f32 to vector<8x256xf32>
    %385 = arith.addf %383, %384 : vector<8x256xf32>
    %386 = arith.mulf %378, %385 : vector<8x256xf32>
    %387 = tpu.concatenate %15, %16, %201, %386 in 0 : vector<8x256xf32>, vector<8x256xf32>, vector<8x256xf32>, vector<8x256xf32> -> vector<32x256xf32>
    %c112 = arith.constant 112 : index
    %c0_221 = arith.constant 0 : index
    %388 = vector.load %arg3[%c112, %c0_221] : memref<144x128xbf16, #tpu.memory_space<vmem>>, vector<32x32xbf16>
    %c112_222 = arith.constant 112 : index
    %c0_223 = arith.constant 0 : index
    %389 = vector.load %arg4[%c112_222, %c0_223] : memref<144x1xf32, #tpu.memory_space<vmem>>, vector<32x1xf32>
    %390 = arith.truncf %387 : vector<32x256xf32> to vector<32x256xbf16>
    %cst_224 = arith.constant dense<0.000000e+00> : vector<32x256xf32>
    %391 = tpu.matmul %388, %390, %cst_224 {dimension_numbers = #tpu.dot_dimension_numbers<[1], [0], [0], [1], [0, 0, 1, 1], [], []>} : vector<32x32xbf16>, vector<32x256xbf16>, vector<32x256xf32> -> vector<32x256xf32>
    %392 = vector.broadcast %389 : vector<32x1xf32> to vector<32x256xf32>
    %393 = arith.addf %391, %392 : vector<32x256xf32>
    %cst_225 = arith.constant 5.000000e-01 : f32
    %394 = vector.broadcast %cst_225 : f32 to vector<32x256xf32>
    %395 = arith.mulf %394, %393 : vector<32x256xf32>
    %396 = math.tanh %395 : vector<32x256xf32>
    %cst_226 = arith.constant 5.000000e-01 : f32
    %397 = vector.broadcast %cst_226 : f32 to vector<32x256xf32>
    %398 = arith.mulf %397, %396 : vector<32x256xf32>
    %cst_227 = arith.constant 5.000000e-01 : f32
    %399 = vector.broadcast %cst_227 : f32 to vector<32x256xf32>
    %400 = arith.addf %398, %399 : vector<32x256xf32>
    %401 = arith.mulf %393, %400 : vector<32x256xf32>
    %c0_228 = arith.constant 0 : index
    %c0_229 = arith.constant 0 : index
    %402 = vector.load %arg5[%c0_228, %c0_229] : memref<32x256xf32, #tpu.memory_space<vmem>>, vector<32x256xf32>
    tpu.vector_store %arg5[%c0_228, %c0_229], %401 {strides = array<i32>} : memref<32x256xf32, #tpu.memory_space<vmem>>, vector<32x256xf32>,
    return
  }
  func.func @transform_0(%arg0: i32) -> (i32, i32) {
    %c0_i32 = arith.constant 0 : i32
    %c0_i32_0 = arith.constant 0 : i32
    return %c0_i32, %arg0 : i32, i32
  }
  func.func @transform_1(%arg0: i32) -> (i32, i32) {
    %c0_i32 = arith.constant 0 : i32
    %c0_i32_0 = arith.constant 0 : i32
    %c0_i32_1 = arith.constant 0 : i32
    return %c0_i32, %c0_i32_0 : i32, i32
  }
  func.func @transform_2(%arg0: i32) -> (i32, i32) {
    %c0_i32 = arith.constant 0 : i32
    %c0_i32_0 = arith.constant 0 : i32
    %c0_i32_1 = arith.constant 0 : i32
    return %c0_i32, %c0_i32_0 : i32, i32
  }
  func.func @transform_3(%arg0: i32) -> (i32, i32) {
    %c0_i32 = arith.constant 0 : i32
    %c0_i32_0 = arith.constant 0 : i32
    %c0_i32_1 = arith.constant 0 : i32
    return %c0_i32, %c0_i32_0 : i32, i32
  }
  func.func @transform_4(%arg0: i32) -> (i32, i32) {
    %c0_i32 = arith.constant 0 : i32
    %c0_i32_0 = arith.constant 0 : i32
    return %c0_i32, %arg0 : i32, i32
  }
}

</mosaic_0001>

<bundles_post_ra>
// kernel: repncspelan_forward.1
= control target key start
LH: loop header
LB: loop body
LE: loop exit
PB: predicated region body
PF: predicated region fallthrough
CT: control target
= control target key end

     0   :  { %s2132_s15 = smov 0   ;;  %s2134_s16 = smov 0   ;;  %s3021_s0 = inlined_call_operand.vmem [shape: f32[16,512], index: 0, kind: input, shape index: {}]   ;;  %s3022_s1 = inlined_call_operand.vmem [shape: f32[9,256], index: 1, kind: input, shape index: {}]   ;;  %s3023_s2 = inlined_call_operand.vmem [shape: bf16[144,128], index: 2, kind: input, shape index: {}]   ;;  %s3024_s3 = inlined_call_operand.vmem [shape: f32[144,1], index: 3, kind: input, shape index: {}]   ;;  %s3025_s4 = inlined_call_operand.vmem [shape: f32[32,512], index: 4, kind: output, shape index: {}]  }
   0x1   :  { %s2136_s17 = smov 0  }
   0x2 LB: > { %s1912_s18 = sadd.s32 4294967295, %s2096_s17   ;;  %s2149_s19 = sadd.s32 1, %s2096_s17   ;;  %s2096_s17 = sphi %s2136_s17, %s3029_s17   ;;  %s2092_s16 = sphi %s2134_s16, %s3028_s16   ;;  %s2088_s15 = sphi %s2132_s15, %s3027_s15  }
   0x3   : > { %s18_s20 = ssub.s32 %s2096_s17, %s2149_s19  ;;  %s21_s21 = sadd.s32 1, %s2092_s16 }
   0x4   : > { %p19_p0 = scmp.eq.s32.totalorder %s18_s20, 0  ;;  %p28_p1 = scmp.ne.s32.totalorder %s2092_s16, %s2088_s15 }
   0x5   : > { %p29_p2 = scmp.eq.s32.totalorder %s2096_s17, 0  ;;  %p121_p3 = scmp.eq.s32.totalorder %s1912_s18, 1 }
   0x6   : > { %s2160_s22 = scalar_select %p19_p0, %s2092_s16, %s21_s21  }
   0x7   : > { %p30_p4 = por %p29_p2, %p28_p1  ;;  %p2162_p5 = por %p121_p3, %p28_p1 }
   0x8   : > { %p1915_p6 = scmp.ge.s32.totalorder %s2096_s17, 2 }
   0xa   : > { %152 = sbr.rel (%p1915_p6) target bundleno = 24 (0x18), region = 28 }
  0x11   : > { %155 = sbr.rel (!%p30_p4) target bundleno = 24 (0x18), region = 32  ;;  %s157_s24 = sand.u32 (%p30_p4), 1, %s2092_s16  }
  0x12   : > { %s1962_s25 = sshll.u32 (%p30_p4), %s2096_s17, 4  ;;  %s1916_s26 = sshll.u32 (%p30_p4), %s157_s24, 5 }
  0x13   : > { %s162_s29 = scalar_lea.vmem (%p30_p4), %s3021_s0, %s1962_s25  ;;  %s159_s30 = scalar_lea.vmem (%p30_p4), [#allocation2], %s1916_s26 }
  0x14   : > { %v175_v0 = vld [vmem:[%s162_s29] sm:$0xff] (%p30_p4)  ;;  %v177_v1 = vld [vmem:[%s162_s29 + $0x8] sm:$0xff] (%p30_p4) }
  0x15   : > { %v179_v2 = vld [vmem:[%s162_s29 + $0x20] sm:$0xff] (%p30_p4)  ;;  %176 = vst [vmem:[%s159_s30] sm:$0xff] (%p30_p4), %v175_v0  ;;  %178 = vst [vmem:[%s159_s30 + $0x8] sm:$0xff] (%p30_p4), %v177_v1  ;;  %v181_v3 = vld [vmem:[%s162_s29 + $0x28] sm:$0xff] (%p30_p4) }
  0x16   : > { %180 = vst [vmem:[%s159_s30 + $0x10] sm:$0xff] (%p30_p4), %v179_v2  ;;  %182 = vst [vmem:[%s159_s30 + $0x18] sm:$0xff] (%p30_p4), %v181_v3 }
  0x18 PF: > { %p1919_p7 = scmp.ge.s32.totalorder %s2096_s17, 1  ;;  %p187_p8 = scmp.lt.s32.totalorder %s2096_s17, 3 }
  0x1a   : > { %p188_p9 = pnand %p1919_p7, %p187_p8 }
  0x1b   : > { %s194_s5 = sand.u32 (!%p188_p9), 1, %s2088_s15   ;;  %v2098_v4 = vmov (!%p188_p9), 0   ;;  %v228_v5 = vld [vmem:[%s3024_s3 + $0x8] sm:$0xff] (!%p188_p9)  ;;  %v314_v6 = vld [vmem:[%s3024_s3 + $0x10] sm:$0xff] (!%p188_p9)  ;;  %v1999_v13 = vld [vmem:[%s3023_s2] sm:$0xff] (!%p188_p9)   ;;  %vm246_vm0 = vcmask (!%p188_p9), 130048   ;;  %v390_v53 = vlaneseq (!%p188_p9) }
  0x1c   : > { %191 = sbr.rel (%p188_p9) target bundleno = 3815 (0xee7), region = 55  ;;  %s1920_s6 = sshll.u32 (!%p188_p9), %s194_s5, 5  ;;  %282 = vmatprep.mubr.bf16.mxu0 (!%p188_p9), %v2098_v4  ;;  %1997 = vset.pattern.permute.xlu0 (!%p188_p9), %v2098_v4  ;;  %vm326_vm1 = vcmask (!%p188_p9), 1043456   ;;  %v313_v34 = vld [vmem:[%s3023_s2 + $0x8] sm:$0xf] (!%p188_p9)  ;;  %vm322_vm2 = vcmask (!%p188_p9), 64512  }
  0x1d   : > { %238 = vperm.xlu0 (!%p188_p9), %1997, %v228_v5   ;;  %365 = vmatprep.mubr.bf16.mxu1 (!%p188_p9), %v2098_v4  ;;  %s196_s11 = scalar_lea.vmem (!%p188_p9), [#allocation2], %s1920_s6  ;;  %s2099_s21 = smov (!%p188_p9), 16   ;;  %v385_v52 = vld [vmem:[%s3024_s3 + $0x18] sm:$0xff] (!%p188_p9)  ;;  %v398_v54 = vshrl.u32 (!%p188_p9), %v390_v53, 7  ;;  %v2256_v57 = vand.u32 (!%p188_p9), 127, %v390_v53  ;;  %vm578_vm11 = vcmask (!%p188_p9), 588800  }
  0x1e   : > { %v222_v7 = vld [vmem:[%s196_s11 + $0x8] sm:$0xff] (!%p188_p9)  ;;  %v224_v8 = vld [vmem:[%s196_s11 + $0x18] sm:$0xff] (!%p188_p9)  ;;  %v221_v9 = vld [vmem:[%s196_s11] sm:$0xff] (!%p188_p9)  ;;  %1998 = vset.pattern.permute.xlu1 (!%p188_p9), %v2098_v4  ;;  %s2100_s24 = smov (!%p188_p9), 17   ;;  %s2101_s25 = smov (!%p188_p9), 15   ;;  %vm1707_vm12 = vcmask (!%p188_p9), 261120  }
  0x1f   : > { %v230_v10 = vpack.c.bf16 (!%p188_p9), %v224_v8, %v222_v7  ;;  %v223_v11 = vld [vmem:[%s196_s11 + $0x10] sm:$0xff] (!%p188_p9)  ;;  %s2102_s26 = smov (!%p188_p9), 1   ;;  %s2103_s27 = smov (!%p188_p9), 127   ;;  %v2258_v58 = vsub.s32 (!%p188_p9), 0, %v398_v54  ;;  %v2263_v60 = vsub.s32 (!%p188_p9), 1, %v398_v54  ;;  %vm392_vm3 = vcmp.lt.s32.totalorder (!%p188_p9), %v2256_v57, 17 }
  0x20   : > { %v229_v12 = vpack.c.bf16 (!%p188_p9), %v223_v11, %v221_v9  ;;  %s2104_s28 = smov (!%p188_p9), 113   ;;  %s2105_s29 = smov (!%p188_p9), 112   ;;  %v395_v59 = vld [vmem:[%s3022_s1] ss:$8 sm:$0x3] (!%p188_p9)  ;;  %vm413_vm4 = vcmp.lt.s32.totalorder (!%p188_p9), %v2256_v57, 16 }
  0x21   : > { %250 = vmatprep.subr.bf16.mxu0 (!%p188_p9), %v230_v10  ;;  %319 = vperm.xlu0 (!%p188_p9), %1997, %v314_v6   ;;  %s2106_s30 = smov (!%p188_p9), 111   ;;  %v1926_v61 = vld [vmem:[%s3022_s1 + $0x1] ss:$8 sm:$0x3] (!%p188_p9)  ;;  %v2270_v0 = vrot.slane (!%p188_p9), %v395_v59, %v2258_v58  ;;  %v2273_v1 = vrot.slane (!%p188_p9), %v395_v59, %v2263_v60  ;;  %vm435_vm5 = vcmp.lt.s32.totalorder (!%p188_p9), %v2256_v57, 15  ;;  %vm457_vm6 = vcmp.lt.s32.totalorder (!%p188_p9), %v2256_v57, 1 }
  0x22   : > { %251 = vmatpush1.bf16.msra.mxu0 (!%p188_p9), %v229_v12  ;;  %v2277_v2 = vrot.slane (!%p188_p9), %v1926_v61, %v2258_v58  ;;  %v2280_v3 = vrot.slane (!%p188_p9), %v1926_v61, %v2263_v60  ;;  %vm479_vm7 = vcmp.lt.s32.totalorder (!%p188_p9), %v2256_v57, 127  ;;  %v1930_v53 = vld [vmem:[%s3022_s1 + $0x6] ss:$8 sm:$0x3] (!%p188_p9)  ;;  %vm501_vm8 = vcmp.lt.s32.totalorder (!%p188_p9), %v2256_v57, 113 }
  0x23   : > { %v1931_v54 = vld [vmem:[%s3022_s1 + $0x7] ss:$8 sm:$0x3]  ;;  %v2352_v61 = vrot.slane %v1930_v53, %v2258_v58  ;;  %vm523_vm9 = vcmp.lt.s32.totalorder %v2256_v57, 112  ;;  %vm545_vm10 = vcmp.lt.s32.totalorder %v2256_v57, 111  ;;  %s1963_s15 = sshll.u32 (%p2162_p5), %s1912_s18, 4 }
  0x25   : > { %1923 = vmatmul.mubr.msk.bf16.vlgmr.msra.gmra.mrb[0].mxu0 %vm246_vm0, %v1999_v13 }
  0x26   : > { %620 = vmatprep.mubr.bf16.mxu0 %v2098_v4 }
  0x9c   : > { %v239_v16 = vpop.permute.xlu0 %238 }
  0xa0   : > { %v320_v35 = vpop.permute.xlu0 %319 }
  0xf8   : > { %v2192_v14 = vpop.f32.mrb[0].mxu0 }
  0xf9   : > { %v2194_v15 = vpop.f32.mrb[1].mxu0 }
  0xfa   : > { %v288_v17 = vpop.f32.mrb[2].mxu0 }
  0xfb   : > { %v289_v18 = vadd.f32 %v288_v17, %v239_v16  ;;  %v290_v19 = vpop.f32.mrb[3].mxu0  ;;  %v1927_v17 = vld [vmem:[%s3022_s1 + $0x2] ss:$8 sm:$0x3] }
  0xfc   : > { %v291_v20 = vadd.f32 %v290_v19, %v239_v16 }
  0xfd   : > { %v295_v21 = vmul.f32 0.5, %v289_v18 }
  0xfe   : > { %v296_v22 = vmul.f32 0.5, %v291_v20 }
  0xff   : > { %2002 = vtanh.f32 %v295_v21 }
 0x100   : > { %2004 = vtanh.f32 %v296_v22  ;;  %v2302_v22 = vrot.slane %v1927_v17, %v2258_v58 }
 0x109   : > { %v2003_v23 = vpop.eup %2002 }
 0x10a   : > { %v2005_v24 = vpop.eup %2004  ;;  %v303_v25 = vmul.f32 0.5, %v2003_v23 }
 0x10b   : > { %v304_v26 = vmul.f32 0.5, %v2005_v24  ;;  %v2305_v24 = vrot.slane %v1927_v17, %v2263_v60 }
 0x10c   : > { %v307_v27 = vadd.f32 0.5, %v303_v25 }
 0x10d   : > { %v308_v28 = vadd.f32 0.5, %v304_v26 }
 0x10e   : > { %v2196_v29 = vmul.f32 %v307_v27, %v289_v18  ;;  %v1928_v18 = vld [vmem:[%s3022_s1 + $0x3] ss:$8 sm:$0x3]  ;;  %v1929_v27 = vld [vmem:[%s3022_s1 + $0x5] ss:$8 sm:$0x3] }
 0x10f   : > { %v2198_v30 = vmul.f32 %v308_v28, %v291_v20  ;;  %v2309_v25 = vrot.slane %v1928_v18, %v2258_v58  ;;  %v2312_v26 = vrot.slane %v1928_v18, %v2263_v60 }
 0x110   : > { %v315_v31 = vpack.c.bf16 %v2196_v29, %v2196_v29 }
 0x111   : > { %v2204_v32 = vpack.c.bf16 %v2198_v30, %v2198_v30 }
 0x112   : > { %v2207_v33 = vsel %vm326_vm1, %v315_v31, 0 }
 0x113   : > { %1924 = vmatprep.subr.msk.bf16.mxu1 %vm326_vm1, %v2204_v32 }
 0x114   : > { %334 = vmatpush1.bf16.msra.mxu1 %v2207_v33 }
 0x117   : > { %1925 = vmatmul.mubr.msk.bf16.vlgmr.msra.gmra.mrb[0].mxu1 %vm322_vm2, %v313_v34 }
 0x118   : > { %761 = vmatprep.mubr.bf16.mxu1 %v2098_v4 }
 0x1ea   : > { %v367_v36 = vpop.f32.mrb[0].mxu1 }
 0x1eb   : > { %v368_v37 = vadd.f32 %v367_v36, %v320_v35  ;;  %v369_v38 = vpop.f32.mrb[1].mxu1 }
 0x1ec   : > { %v370_v39 = vadd.f32 %v369_v38, %v320_v35  ;;  %v371_v40 = vpop.f32.mrb[2].mxu1  ;;  %v2330_v38 = vrot.slane %v1929_v27, %v2263_v60 }
 0x1ed   : > { %v374_v41 = vmul.f32 0.5, %v368_v37  ;;  %v372_v42 = vpop.f32.mrb[3].mxu1 }
 0x1ee   : > { %v375_v43 = vmul.f32 0.5, %v370_v39 }
 0x1ef   : > { %2006 = vtanh.f32 %v374_v41 }
 0x1f0   : > { %2008 = vtanh.f32 %v375_v43 }
 0x1f9   : > { %v2007_v44 = vpop.eup %2006 }
 0x1fa   : > { %v2009_v45 = vpop.eup %2008  ;;  %v378_v46 = vmul.f32 0.5, %v2007_v44 }
 0x1fb   : > { %v379_v47 = vmul.f32 0.5, %v2009_v45 }
 0x1fc   : > { %v380_v48 = vadd.f32 0.5, %v378_v46 }
 0x1fd   : > { %v381_v50 = vadd.f32 0.5, %v379_v47 }
 0x1fe   : > { %v2217_v49 = vmul.f32 %v380_v48, %v368_v37  ;;  %v2327_v37 = vrot.slane %v1929_v27, %v2258_v58 }
 0x1ff   : > { %v2223_v51 = vmul.f32 %v381_v50, %v370_v39 }
 0x200   : > { %409 = vrot.lane.b32.xlu0 %v2217_v49, %s2099_s21  ;;  %386 = vrot.lane.b32.xlu1 %v2217_v49, %s2100_s24 }
 0x204   : > { %431 = vrot.lane.b32.xlu0 %v2217_v49, %s2101_s25  ;;  %388 = vrot.lane.b32.xlu1 %v2223_v51, %s2100_s24 }
 0x208   : > { %453 = vrot.lane.b32.xlu0 %v2217_v49, %s2102_s26  ;;  %411 = vrot.lane.b32.xlu1 %v2223_v51, %s2099_s21 }
 0x20c   : > { %475 = vrot.lane.b32.xlu0 %v2217_v49, %s2103_s27  ;;  %433 = vrot.lane.b32.xlu1 %v2223_v51, %s2101_s25 }
 0x210   : > { %497 = vrot.lane.b32.xlu0 %v2217_v49, %s2104_s28  ;;  %455 = vrot.lane.b32.xlu1 %v2223_v51, %s2102_s26 }
 0x214   : > { %519 = vrot.lane.b32.xlu0 %v2217_v49, %s2105_s29  ;;  %477 = vrot.lane.b32.xlu1 %v2223_v51, %s2103_s27 }
 0x218   : > { %541 = vrot.lane.b32.xlu0 %v2217_v49, %s2106_s30  ;;  %499 = vrot.lane.b32.xlu1 %v2223_v51, %s2104_s28 }
 0x21c   : > { %575 = vperm.xlu0 %1997, %v385_v52   ;;  %521 = vrot.lane.b32.xlu1 %v2223_v51, %s2105_s29 }
 0x220   : > { %543 = vrot.lane.b32.xlu1 %v2223_v51, %s2106_s30 }
 0x272   : > { %v410_v55 = vpop.permute.xlu0 %409  ;;  %v387_v56 = vpop.permute.xlu1 %386 }
 0x276   : > { %v432_v62 = vpop.permute.xlu0 %431  ;;  %v389_v63 = vpop.permute.xlu1 %388 }
 0x277   : > { %v393_v5 = vsel %vm392_vm3, %v387_v56, %v389_v63  ;;  %v394_v6 = vsel %vm392_vm3, %v389_v63, %v387_v56  ;;  %v2355_v63 = vrot.slane %v1930_v53, %v2263_v60 }
 0x278   : > { %v407_v11 = vmul.f32 %v2270_v0, %v394_v6  ;;  %v408_v12 = vmul.f32 %v2273_v1, %v393_v5  ;;  %v2359_v5 = vrot.slane %v1931_v54, %v2258_v58  ;;  %v2362_v6 = vrot.slane %v1931_v54, %v2263_v60 }
 0x27a   : > { %v454_v7 = vpop.permute.xlu0 %453  ;;  %v412_v8 = vpop.permute.xlu1 %411 }
 0x27b   : > { %v414_v9 = vsel %vm413_vm4, %v410_v55, %v412_v8  ;;  %v415_v10 = vsel %vm413_vm4, %v412_v8, %v410_v55 }
 0x27c   : > { %v429_v13 = vmul.f32 %v2277_v2, %v415_v10  ;;  %v430_v16 = vmul.f32 %v2280_v3, %v414_v9 }
 0x27e   : > { %v563_v19 = vpack.c.bf16 %v429_v13, %v407_v11  ;;  %v434_v20 = vpop.permute.xlu1 %433  ;;  %v564_v21 = vpack.c.bf16 %v430_v16, %v408_v12  ;;  %v476_v23 = vpop.permute.xlu0 %475 }
 0x27f   : > { %v436_v28 = vsel %vm435_vm5, %v432_v62, %v434_v20  ;;  %v437_v31 = vsel %vm435_vm5, %v434_v20, %v432_v62 }
 0x280   : > { %588 = vmatprep.subr.bf16.mxu0 %v564_v21  ;;  %v451_v39 = vmul.f32 %v2302_v22, %v437_v31  ;;  %v452_v40 = vmul.f32 %v2305_v24, %v436_v28 }
 0x281   : > { %589 = vmatpush1.bf16.msra.mxu0 %v563_v19 }
 0x282   : > { %v456_v34 = vpop.permute.xlu1 %455  ;;  %v498_v43 = vpop.permute.xlu0 %497 }
 0x283   : > { %v458_v35 = vsel %vm457_vm6, %v454_v7, %v456_v34  ;;  %v459_v36 = vsel %vm457_vm6, %v456_v34, %v454_v7  ;;  %v1932_v7 = vld [vmem:[%s3022_s1 + $0x10] ss:$8 sm:$0x3] }
 0x284   : > { %v473_v41 = vmul.f32 %v2309_v25, %v459_v36  ;;  %v474_v42 = vmul.f32 %v2312_v26, %v458_v35  ;;  %v2377_v13 = vrot.slane %v1932_v7, %v2258_v58  ;;  %v2380_v16 = vrot.slane %v1932_v7, %v2263_v60 }
 0x286   : > { %v565_v44 = vpack.c.bf16 %v473_v41, %v451_v39  ;;  %v478_v45 = vpop.permute.xlu1 %477  ;;  %v566_v46 = vpack.c.bf16 %v474_v42, %v452_v40  ;;  %v520_v62 = vpop.permute.xlu0 %519  ;;  %v384_v40 = vld [vmem:[%s3023_s2 + $0xc] sm:$0xf]  ;;  %v782_v41 = vld [vmem:[%s3023_s2 + $0x14] sm:$0xf] }
 0x287   : > { %v480_v47 = vsel %vm479_vm7, %v476_v23, %v478_v45  ;;  %v481_v48 = vsel %vm479_vm7, %v478_v45, %v476_v23 }
 0x288   : > { %v495_v50 = vmul.f32 %v2327_v37, %v480_v47  ;;  %v496_v52 = vmul.f32 %v2330_v38, %v481_v48  ;;  %590 = vmatprep.subr.bf16.mxu0 %v566_v46 }
 0x289   : > { %591 = vmatpush1.bf16.msra.mxu0 %v565_v44 }
 0x28a   : > { %v567_v55 = vpack.c.bf16 %v495_v50, %v2217_v49  ;;  %v500_v56 = vpop.permute.xlu1 %499  ;;  %v568_v59 = vpack.c.bf16 %v496_v52, %v2223_v51  ;;  %v542_v21 = vpop.permute.xlu0 %541 }
 0x28b   : > { %v502_v8 = vsel %vm501_vm8, %v498_v43, %v500_v56  ;;  %v503_v9 = vsel %vm501_vm8, %v500_v56, %v498_v43 }
 0x28c   : > { %592 = vmatprep.subr.bf16.mxu0 %v568_v59  ;;  %v517_v17 = vmul.f32 %v2352_v61, %v502_v8  ;;  %v518_v18 = vmul.f32 %v2355_v63, %v503_v9 }
 0x28d   : > { %593 = vmatpush1.bf16.msra.mxu0 %v567_v55 }
 0x28e   : > { %v522_v10 = vpop.permute.xlu1 %521 }
 0x28f   : > { %v524_v11 = vsel %vm523_vm9, %v520_v62, %v522_v10  ;;  %v525_v12 = vsel %vm523_vm9, %v522_v10, %v520_v62 }
 0x290   : > { %v539_v19 = vmul.f32 %v2359_v5, %v524_v11  ;;  %v540_v20 = vmul.f32 %v2362_v6, %v525_v12  ;;  %v783_v11 = vld [vmem:[%s3024_s3 + $0x28] sm:$0xff]  ;;  %v640_v12 = vld [vmem:[%s3024_s3 + $0x20] sm:$0xff] }
 0x292   : > { %v569_v23 = vpack.c.bf16 %v539_v19, %v517_v17  ;;  %v544_v27 = vpop.permute.xlu1 %543  ;;  %v570_v28 = vpack.c.bf16 %v540_v20, %v518_v18  ;;  %v844_v17 = vld [vmem:[%s3024_s3 + $0x30] sm:$0xff] }
 0x293   : > { %v546_v31 = vsel %vm545_vm10, %v542_v21, %v544_v27  ;;  %v547_v58 = vsel %vm545_vm10, %v544_v27, %v542_v21 }
 0x294   : > { %v561_v60 = vmul.f32 %v2377_v13, %v546_v31  ;;  %v562_v34 = vmul.f32 %v2380_v16, %v547_v58  ;;  %594 = vmatprep.subr.bf16.mxu0 %v570_v28 }
 0x295   : > { %595 = vmatpush1.bf16.msra.mxu0 %v569_v23 }
 0x296   : > { %v571_v35 = vpack.c.bf16 %v561_v60, %v561_v60  ;;  %v572_v36 = vpack.c.bf16 %v562_v34, %v562_v34 }
 0x298   : > { %1933 = vmatprep.subr.msk.bf16.mxu0 %vm326_vm1, %v572_v36  ;;  %v583_v39 = vsel %vm326_vm1, %v571_v35, 0 }
 0x299   : > { %597 = vmatpush1.bf16.msra.mxu0 %v583_v39 }
 0x29a   : > { %1937 = vmatprep.subr.msk.bf16.mxu0 %vm326_vm1, %v2204_v32 }
 0x29b   : > { %v576_v42 = vpop.permute.xlu0 %575 }
 0x29c   : > { %1934 = vmatmul.mubr.msk.bf16.vlgmr.msra.gmra.mrb[4].mxu0 %vm578_vm11, %v384_v40 }
 0x29d   : > { %793 = vmatpush1.bf16.msra.mxu0 %v2207_v33  ;;  %824 = vmatprep.mubr.bf16.mxu0 %v2098_v4 }
 0x2a4   : > { %1938 = vmatmul.mubr.msk.bf16.vlgmr.msra.gmra.mrb[8].mxu0 %vm322_vm2, %v782_v41 }
 0x2a5   : > { %1028 = vmatprep.mubr.bf16.mxu0 %v2098_v4 }
 0x36f   : > { %v622_v43 = vpop.f32.mrb[4].mxu0 }
 0x370   : > { %v623_v44 = vadd.f32 %v622_v43, %v576_v42  ;;  %v624_v45 = vpop.f32.mrb[5].mxu0 }
 0x371   : > { %v625_v46 = vadd.f32 %v624_v45, %v576_v42  ;;  %v626_v32 = vpop.f32.mrb[6].mxu0 }
 0x372   : > { %v629_v47 = vmul.f32 0.5, %v623_v44  ;;  %v627_v48 = vpop.f32.mrb[7].mxu0 }
 0x373   : > { %v630_v50 = vmul.f32 0.5, %v625_v46 }
 0x374   : > { %2010 = vtanh.f32 %v629_v47 }
 0x375   : > { %2012 = vtanh.f32 %v630_v50 }
 0x377   : > { %v2439_v7 = vpop.f32.mrb[8].mxu0 }
 0x378   : > { %v2441_v8 = vpop.f32.mrb[9].mxu0 }
 0x379   : > { %v830_v9 = vpop.f32.mrb[10].mxu0 }
 0x37a   : > { %v831_v10 = vpop.f32.mrb[11].mxu0 }
 0x37e   : > { %v2011_v33 = vpop.eup %2010 }
 0x37f   : > { %v2013_v52 = vpop.eup %2012  ;;  %v633_v53 = vmul.f32 0.5, %v2011_v33 }
 0x380   : > { %v634_v54 = vmul.f32 0.5, %v2013_v52 }
 0x381   : > { %v635_v55 = vadd.f32 0.5, %v633_v53 }
 0x382   : > { %v636_v56 = vadd.f32 0.5, %v634_v54 }
 0x383   : > { %v2407_v59 = vmul.f32 %v635_v55, %v623_v44 }
 0x384   : > { %v2409_v62 = vmul.f32 %v636_v56, %v625_v46 }
 0x385   : > { %641 = vrot.lane.b32.xlu1 %v2407_v59, %s2100_s24 }
 0x386   : > { %643 = vrot.lane.b32.xlu0 %v2409_v62, %s2100_s24 }
 0x389   : > { %649 = vrot.lane.b32.xlu1 %v2407_v59, %s2099_s21 }
 0x38a   : > { %651 = vrot.lane.b32.xlu0 %v2409_v62, %s2099_s21 }
 0x38d   : > { %657 = vrot.lane.b32.xlu1 %v2407_v59, %s2101_s25 }
 0x38e   : > { %659 = vrot.lane.b32.xlu0 %v2409_v62, %s2101_s25 }
 0x391   : > { %665 = vrot.lane.b32.xlu1 %v2407_v59, %s2102_s26 }
 0x392   : > { %667 = vrot.lane.b32.xlu0 %v2409_v62, %s2102_s26 }
 0x395   : > { %673 = vrot.lane.b32.xlu1 %v2407_v59, %s2103_s27 }
 0x396   : > { %675 = vrot.lane.b32.xlu0 %v2409_v62, %s2103_s27 }
 0x399   : > { %681 = vrot.lane.b32.xlu1 %v2407_v59, %s2104_s28 }
 0x39a   : > { %683 = vrot.lane.b32.xlu0 %v2409_v62, %s2104_s28 }
 0x39d   : > { %689 = vrot.lane.b32.xlu1 %v2407_v59, %s2105_s29 }
 0x39e   : > { %691 = vrot.lane.b32.xlu0 %v2409_v62, %s2105_s29 }
 0x3a1   : > { %697 = vrot.lane.b32.xlu1 %v2407_v59, %s2106_s30 }
 0x3a2   : > { %699 = vrot.lane.b32.xlu0 %v2409_v62, %s2106_s30 }
 0x3a5   : > { %717 = vperm.xlu1 %1998, %v640_v12  }
 0x3a6   : > { %786 = vperm.xlu0 %1997, %v783_v11  }
 0x3a9   : > { %849 = vperm.xlu1 %1998, %v844_v17  }
 0x3f7   : > { %v642_v18 = vpop.permute.xlu1 %641 }
 0x3f8   : > { %v644_v19 = vpop.permute.xlu0 %643 }
 0x3f9   : > { %v645_v20 = vsel %vm392_vm3, %v642_v18, %v644_v19  ;;  %v646_v21 = vsel %vm392_vm3, %v644_v19, %v642_v18 }
 0x3fa   : > { %v647_v58 = vmul.f32 %v646_v21, %v2270_v0  ;;  %v648_v60 = vmul.f32 %v645_v20, %v2273_v1 }
 0x3fb   : > { %v650_v23 = vpop.permute.xlu1 %649 }
 0x3fc   : > { %v652_v27 = vpop.permute.xlu0 %651 }
 0x3fd   : > { %v653_v28 = vsel %vm413_vm4, %v650_v23, %v652_v27  ;;  %v654_v31 = vsel %vm413_vm4, %v652_v27, %v650_v23 }
 0x3fe   : > { %v655_v34 = vmul.f32 %v654_v31, %v2277_v2  ;;  %v656_v35 = vmul.f32 %v653_v28, %v2280_v3 }
 0x3ff   : > { %v658_v36 = vpop.permute.xlu1 %657 }
 0x400   : > { %v705_v39 = vpack.c.bf16 %v655_v34, %v647_v58  ;;  %v660_v40 = vpop.permute.xlu0 %659  ;;  %v706_v41 = vpack.c.bf16 %v656_v35, %v648_v60 }
 0x401   : > { %v661_v42 = vsel %vm435_vm5, %v658_v36, %v660_v40  ;;  %v662_v43 = vsel %vm435_vm5, %v660_v40, %v658_v36 }
 0x402   : > { %729 = vmatprep.subr.bf16.mxu1 %v706_v41  ;;  %v663_v47 = vmul.f32 %v662_v43, %v2302_v22  ;;  %v664_v48 = vmul.f32 %v661_v42, %v2305_v24 }
 0x403   : > { %730 = vmatpush1.bf16.msra.mxu1 %v705_v39  ;;  %v666_v44 = vpop.permute.xlu1 %665 }
 0x404   : > { %v668_v45 = vpop.permute.xlu0 %667 }
 0x405   : > { %v669_v46 = vsel %vm457_vm6, %v666_v44, %v668_v45  ;;  %v670_v32 = vsel %vm457_vm6, %v668_v45, %v666_v44 }
 0x406   : > { %v671_v50 = vmul.f32 %v670_v32, %v2309_v25  ;;  %v672_v33 = vmul.f32 %v669_v46, %v2312_v26  ;;  %v639_v32 = vld [vmem:[%s3023_s2 + $0x10] sm:$0xf] }
 0x407   : > { %v674_v52 = vpop.permute.xlu1 %673 }
 0x408   : > { %v707_v53 = vpack.c.bf16 %v671_v50, %v663_v47  ;;  %v676_v54 = vpop.permute.xlu0 %675  ;;  %v708_v55 = vpack.c.bf16 %v672_v33, %v664_v48 }
 0x409   : > { %v677_v56 = vsel %vm479_vm7, %v674_v52, %v676_v54  ;;  %v678_v9 = vsel %vm479_vm7, %v676_v54, %v674_v52 }
 0x40a   : > { %v679_v10 = vmul.f32 %v677_v56, %v2327_v37  ;;  %v680_v11 = vmul.f32 %v678_v9, %v2330_v38  ;;  %731 = vmatprep.subr.bf16.mxu1 %v708_v55 }
 0x40b   : > { %732 = vmatpush1.bf16.msra.mxu1 %v707_v53  ;;  %v682_v12 = vpop.permute.xlu1 %681 }
 0x40c   : > { %v709_v17 = vpack.c.bf16 %v679_v10, %v2407_v59  ;;  %v684_v18 = vpop.permute.xlu0 %683  ;;  %v710_v19 = vpack.c.bf16 %v680_v11, %v2409_v62 }
 0x40d   : > { %v685_v20 = vsel %vm501_vm8, %v682_v12, %v684_v18  ;;  %v686_v21 = vsel %vm501_vm8, %v684_v18, %v682_v12 }
 0x40e   : > { %733 = vmatprep.subr.bf16.mxu1 %v710_v19  ;;  %v687_v59 = vmul.f32 %v685_v20, %v2352_v61  ;;  %v688_v62 = vmul.f32 %v686_v21, %v2355_v63 }
 0x40f   : > { %734 = vmatpush1.bf16.msra.mxu1 %v709_v17  ;;  %v690_v23 = vpop.permute.xlu1 %689 }
 0x410   : > { %v692_v27 = vpop.permute.xlu0 %691 }
 0x411   : > { %v693_v28 = vsel %vm523_vm9, %v690_v23, %v692_v27  ;;  %v694_v31 = vsel %vm523_vm9, %v692_v27, %v690_v23 }
 0x412   : > { %v695_v58 = vmul.f32 %v693_v28, %v2359_v5  ;;  %v696_v60 = vmul.f32 %v694_v31, %v2362_v6 }
 0x413   : > { %v698_v34 = vpop.permute.xlu1 %697 }
 0x414   : > { %v711_v35 = vpack.c.bf16 %v695_v58, %v687_v59  ;;  %v700_v36 = vpop.permute.xlu0 %699  ;;  %v712_v39 = vpack.c.bf16 %v696_v60, %v688_v62 }
 0x415   : > { %v701_v40 = vsel %vm545_vm10, %v698_v34, %v700_v36  ;;  %v702_v41 = vsel %vm545_vm10, %v700_v36, %v698_v34 }
 0x416   : > { %v703_v42 = vmul.f32 %v701_v40, %v2377_v13  ;;  %v704_v43 = vmul.f32 %v702_v41, %v2380_v16  ;;  %735 = vmatprep.subr.bf16.mxu1 %v712_v39 }
 0x417   : > { %736 = vmatpush1.bf16.msra.mxu1 %v711_v35 }
 0x418   : > { %v713_v44 = vpack.c.bf16 %v703_v42, %v703_v42  ;;  %v714_v45 = vpack.c.bf16 %v704_v43, %v704_v43  ;;  %v843_v42 = vld [vmem:[%s3023_s2 + $0x18] sm:$0xf] }
 0x41a   : > { %1935 = vmatprep.subr.msk.bf16.mxu1 %vm326_vm1, %v714_v45  ;;  %v724_v46 = vsel %vm326_vm1, %v713_v44, 0 }
 0x41b   : > { %738 = vmatpush1.bf16.msra.mxu1 %v724_v46 }
 0x41e   : > { %1936 = vmatmul.mubr.msk.bf16.vlgmr.msra.gmra.mrb[4].mxu1 %vm578_vm11, %v639_v32 }
 0x41f   : > { %887 = vmatprep.mubr.bf16.mxu1 %v2098_v4 }
 0x424   : > { %v718_v53 = vpop.permute.xlu1 %717 }
 0x425   : > { %v787_v47 = vpop.permute.xlu0 %786 }
 0x426   : > { %v827_v48 = vadd.f32 %v2439_v7, %v787_v47  ;;  %v829_v50 = vadd.f32 %v2441_v8, %v787_v47 }
 0x428   : > { %v833_v33 = vmul.f32 0.5, %v827_v48  ;;  %v834_v52 = vmul.f32 0.5, %v829_v50  ;;  %v850_v43 = vpop.permute.xlu1 %849 }
 0x42a   : > { %2014 = vtanh.f32 %v833_v33 }
 0x42b   : > { %2016 = vtanh.f32 %v834_v52 }
 0x434   : > { %v2015_v18 = vpop.eup %2014 }
 0x435   : > { %v2017_v19 = vpop.eup %2016  ;;  %v837_v7 = vmul.f32 0.5, %v2015_v18 }
 0x436   : > { %v838_v8 = vmul.f32 0.5, %v2017_v19 }
 0x437   : > { %v839_v28 = vadd.f32 0.5, %v837_v7 }
 0x438   : > { %v840_v59 = vadd.f32 0.5, %v838_v8 }
 0x439   : > { %v841_v34 = vmul.f32 %v839_v28, %v827_v48 }
 0x43a   : > { %v842_v36 = vmul.f32 %v840_v59, %v829_v50 }
 0x4f1   : > { %v763_v54 = vpop.f32.mrb[4].mxu1 }
 0x4f2   : > { %v764_v55 = vadd.f32 %v763_v54, %v718_v53  ;;  %v765_v56 = vpop.f32.mrb[5].mxu1 }
 0x4f3   : > { %v766_v9 = vadd.f32 %v765_v56, %v718_v53  ;;  %v767_v10 = vpop.f32.mrb[6].mxu1 }
 0x4f4   : > { %v770_v11 = vmul.f32 0.5, %v764_v55  ;;  %v768_v12 = vpop.f32.mrb[7].mxu1  ;;  %v907_v10 = vld [vmem:[%s3024_s3 + $0x38] sm:$0xff] }
 0x4f5   : > { %v771_v17 = vmul.f32 0.5, %v766_v9 }
 0x4f6   : > { %2018 = vtanh.f32 %v770_v11  ;;  %v1048_v11 = vld [vmem:[%s3024_s3 + $0x40] sm:$0xff] }
 0x4f7   : > { %2020 = vtanh.f32 %v771_v17 }
 0x500   : > { %v2019_v20 = vpop.eup %2018 }
 0x501   : > { %v2021_v21 = vpop.eup %2020  ;;  %v774_v23 = vmul.f32 0.5, %v2019_v20 }
 0x502   : > { %v775_v27 = vmul.f32 0.5, %v2021_v21 }
 0x503   : > { %v776_v31 = vadd.f32 0.5, %v774_v23 }
 0x504   : > { %v777_v62 = vadd.f32 0.5, %v775_v27 }
 0x505   : > { %v778_v58 = vmul.f32 %v776_v31, %v764_v55 }
 0x506   : > { %v779_v60 = vmul.f32 %v777_v62, %v766_v9 }
 0x507   : > { %v780_v35 = vadd.f32 %v778_v58, %v2217_v49 }
 0x508   : > { %v781_v39 = vadd.f32 %v779_v60, %v2223_v51 }
 0x509   : > { %v845_v40 = vpack.c.bf16 %v841_v34, %v780_v35 }
 0x50a   : > { %v846_v41 = vpack.c.bf16 %v842_v36, %v781_v39 }
 0x50c   : > { %855 = vmatprep.subr.bf16.mxu1 %v846_v41 }
 0x50d   : > { %856 = vmatpush1.bf16.msra.mxu1 %v845_v40 }
 0x510   : > { %1939 = vmatmul.mubr.msk.bf16.vlgmr.msra.gmra.mrb[8].mxu1 %vm246_vm0, %v843_v42 }
 0x511   : > { %1097 = vmatprep.mubr.bf16.mxu1 %v2098_v4 }
 0x5e3   : > { %v889_v44 = vpop.f32.mrb[8].mxu1 }
 0x5e4   : > { %v890_v45 = vadd.f32 %v889_v44, %v850_v43  ;;  %v891_v46 = vpop.f32.mrb[9].mxu1 }
 0x5e5   : > { %v892_v49 = vadd.f32 %v891_v46, %v850_v43  ;;  %v893_v32 = vpop.f32.mrb[10].mxu1 }
 0x5e6   : > { %v896_v47 = vmul.f32 0.5, %v890_v45  ;;  %v894_v51 = vpop.f32.mrb[11].mxu1 }
 0x5e7   : > { %v897_v48 = vmul.f32 0.5, %v892_v49 }
 0x5e8   : > { %2022 = vtanh.f32 %v896_v47 }
 0x5e9   : > { %2024 = vtanh.f32 %v897_v48 }
 0x5f2   : > { %v2023_v50 = vpop.eup %2022 }
 0x5f3   : > { %v2025_v33 = vpop.eup %2024  ;;  %v900_v52 = vmul.f32 0.5, %v2023_v50 }
 0x5f4   : > { %v901_v53 = vmul.f32 0.5, %v2025_v33 }
 0x5f5   : > { %v902_v54 = vadd.f32 0.5, %v900_v52 }
 0x5f6   : > { %v903_v55 = vadd.f32 0.5, %v901_v53 }
 0x5f7   : > { %v2522_v56 = vmul.f32 %v902_v54, %v890_v45 }
 0x5f8   : > { %v2524_v9 = vmul.f32 %v903_v55, %v892_v49 }
 0x5f9   : > { %908 = vrot.lane.b32.xlu0 %v2522_v56, %s2100_s24 }
 0x5fa   : > { %910 = vrot.lane.b32.xlu1 %v2524_v9, %s2100_s24 }
 0x5fd   : > { %916 = vrot.lane.b32.xlu0 %v2522_v56, %s2099_s21 }
 0x5fe   : > { %918 = vrot.lane.b32.xlu1 %v2524_v9, %s2099_s21 }
 0x601   : > { %924 = vrot.lane.b32.xlu0 %v2522_v56, %s2101_s25 }
 0x602   : > { %926 = vrot.lane.b32.xlu1 %v2524_v9, %s2101_s25 }
 0x605   : > { %932 = vrot.lane.b32.xlu0 %v2522_v56, %s2102_s26 }
 0x606   : > { %934 = vrot.lane.b32.xlu1 %v2524_v9, %s2102_s26 }
 0x609   : > { %940 = vrot.lane.b32.xlu0 %v2522_v56, %s2103_s27 }
 0x60a   : > { %942 = vrot.lane.b32.xlu1 %v2524_v9, %s2103_s27 }
 0x60d   : > { %948 = vrot.lane.b32.xlu0 %v2522_v56, %s2104_s28 }
 0x60e   : > { %950 = vrot.lane.b32.xlu1 %v2524_v9, %s2104_s28 }
 0x611   : > { %956 = vrot.lane.b32.xlu0 %v2522_v56, %s2105_s29 }
 0x612   : > { %958 = vrot.lane.b32.xlu1 %v2524_v9, %s2105_s29 }
 0x615   : > { %964 = vrot.lane.b32.xlu0 %v2522_v56, %s2106_s30 }
 0x616   : > { %966 = vrot.lane.b32.xlu1 %v2524_v9, %s2106_s30 }
 0x619   : > { %984 = vperm.xlu0 %1997, %v907_v10  }
 0x61a   : > { %1053 = vperm.xlu1 %1998, %v1048_v11  }
 0x66b   : > { %v909_v12 = vpop.permute.xlu0 %908 }
 0x66c   : > { %v911_v17 = vpop.permute.xlu1 %910 }
 0x66d   : > { %v912_v18 = vsel %vm392_vm3, %v909_v12, %v911_v17  ;;  %v913_v19 = vsel %vm392_vm3, %v911_v17, %v909_v12 }
 0x66e   : > { %v914_v23 = vmul.f32 %v913_v19, %v2270_v0  ;;  %v915_v27 = vmul.f32 %v912_v18, %v2273_v1 }
 0x66f   : > { %v917_v7 = vpop.permute.xlu0 %916 }
 0x670   : > { %v919_v20 = vpop.permute.xlu1 %918 }
 0x671   : > { %v920_v8 = vsel %vm413_vm4, %v917_v7, %v919_v20  ;;  %v921_v21 = vsel %vm413_vm4, %v919_v20, %v917_v7 }
 0x672   : > { %v922_v28 = vmul.f32 %v921_v21, %v2277_v2  ;;  %v923_v31 = vmul.f32 %v920_v8, %v2280_v3 }
 0x673   : > { %v925_v59 = vpop.permute.xlu0 %924 }
 0x674   : > { %v972_v62 = vpack.c.bf16 %v922_v28, %v914_v23  ;;  %v927_v58 = vpop.permute.xlu1 %926  ;;  %v973_v60 = vpack.c.bf16 %v923_v31, %v915_v27 }
 0x675   : > { %v928_v34 = vsel %vm435_vm5, %v925_v59, %v927_v58  ;;  %v929_v35 = vsel %vm435_vm5, %v927_v58, %v925_v59 }
 0x676   : > { %996 = vmatprep.subr.bf16.mxu0 %v973_v60  ;;  %v930_v42 = vmul.f32 %v929_v35, %v2302_v22  ;;  %v931_v43 = vmul.f32 %v928_v34, %v2305_v24  ;;  %v906_v35 = vld [vmem:[%s3023_s2 + $0x1c] sm:$0xf] }
 0x677   : > { %997 = vmatpush1.bf16.msra.mxu0 %v972_v62  ;;  %v933_v36 = vpop.permute.xlu0 %932 }
 0x678   : > { %v935_v39 = vpop.permute.xlu1 %934 }
 0x679   : > { %v936_v40 = vsel %vm457_vm6, %v933_v36, %v935_v39  ;;  %v937_v41 = vsel %vm457_vm6, %v935_v39, %v933_v36 }
 0x67a   : > { %v938_v44 = vmul.f32 %v937_v41, %v2309_v25  ;;  %v939_v45 = vmul.f32 %v936_v40, %v2312_v26 }
 0x67b   : > { %v941_v46 = vpop.permute.xlu0 %940 }
 0x67c   : > { %v974_v49 = vpack.c.bf16 %v938_v44, %v930_v42  ;;  %v943_v32 = vpop.permute.xlu1 %942  ;;  %v975_v47 = vpack.c.bf16 %v939_v45, %v931_v43 }
 0x67d   : > { %v944_v51 = vsel %vm479_vm7, %v941_v46, %v943_v32  ;;  %v945_v48 = vsel %vm479_vm7, %v943_v32, %v941_v46 }
 0x67e   : > { %v946_v50 = vmul.f32 %v944_v51, %v2327_v37  ;;  %v947_v33 = vmul.f32 %v945_v48, %v2330_v38  ;;  %998 = vmatprep.subr.bf16.mxu0 %v975_v47 }
 0x67f   : > { %999 = vmatpush1.bf16.msra.mxu0 %v974_v49  ;;  %v949_v52 = vpop.permute.xlu0 %948 }
 0x680   : > { %v976_v53 = vpack.c.bf16 %v946_v50, %v2522_v56  ;;  %v951_v54 = vpop.permute.xlu1 %950  ;;  %v977_v55 = vpack.c.bf16 %v947_v33, %v2524_v9 }
 0x681   : > { %v952_v10 = vsel %vm501_vm8, %v949_v52, %v951_v54  ;;  %v953_v11 = vsel %vm501_vm8, %v951_v54, %v949_v52 }
 0x682   : > { %1000 = vmatprep.subr.bf16.mxu0 %v977_v55  ;;  %v954_v56 = vmul.f32 %v952_v10, %v2352_v61  ;;  %v955_v9 = vmul.f32 %v953_v11, %v2355_v63  ;;  %v1047_v10 = vld [vmem:[%s3023_s2 + $0x20] sm:$0xf] }
 0x683   : > { %1001 = vmatpush1.bf16.msra.mxu0 %v976_v53  ;;  %v957_v12 = vpop.permute.xlu0 %956 }
 0x684   : > { %v959_v17 = vpop.permute.xlu1 %958 }
 0x685   : > { %v960_v18 = vsel %vm523_vm9, %v957_v12, %v959_v17  ;;  %v961_v19 = vsel %vm523_vm9, %v959_v17, %v957_v12 }
 0x686   : > { %v962_v7 = vmul.f32 %v960_v18, %v2359_v5  ;;  %v963_v20 = vmul.f32 %v961_v19, %v2362_v6 }
 0x687   : > { %v965_v8 = vpop.permute.xlu0 %964 }
 0x688   : > { %v978_v21 = vpack.c.bf16 %v962_v7, %v954_v56  ;;  %v967_v23 = vpop.permute.xlu1 %966  ;;  %v979_v27 = vpack.c.bf16 %v963_v20, %v955_v9 }
 0x689   : > { %v968_v28 = vsel %vm545_vm10, %v965_v8, %v967_v23  ;;  %v969_v31 = vsel %vm545_vm10, %v967_v23, %v965_v8 }
 0x68a   : > { %v970_v59 = vmul.f32 %v968_v28, %v2377_v13  ;;  %v971_v62 = vmul.f32 %v969_v31, %v2380_v16  ;;  %1002 = vmatprep.subr.bf16.mxu0 %v979_v27 }
 0x68b   : > { %1003 = vmatpush1.bf16.msra.mxu0 %v978_v21 }
 0x68c   : > { %v980_v58 = vpack.c.bf16 %v970_v59, %v970_v59  ;;  %v981_v60 = vpack.c.bf16 %v971_v62, %v971_v62 }
 0x68e   : > { %1940 = vmatprep.subr.msk.bf16.mxu0 %vm326_vm1, %v981_v60  ;;  %v991_v34 = vsel %vm326_vm1, %v980_v58, 0  ;;  %v1117_v58 = vld [vmem:[%s3024_s3 + $0x48] sm:$0xff] }
 0x68f   : > { %1005 = vmatpush1.bf16.msra.mxu0 %v991_v34 }
 0x692   : > { %1941 = vmatmul.mubr.msk.bf16.vlgmr.msra.gmra.mrb[12].mxu0 %vm578_vm11, %v906_v35 }
 0x693   : > { %1379 = vmatprep.mubr.bf16.mxu0 %v2098_v4 }
 0x698   : > { %v985_v36 = vpop.permute.xlu0 %984 }
 0x699   : > { %v1054_v11 = vpop.permute.xlu1 %1053 }
 0x765   : > { %v1030_v39 = vpop.f32.mrb[12].mxu0 }
 0x766   : > { %v1031_v40 = vadd.f32 %v1030_v39, %v985_v36  ;;  %v1032_v41 = vpop.f32.mrb[13].mxu0 }
 0x767   : > { %v1033_v42 = vadd.f32 %v1032_v41, %v985_v36  ;;  %v1034_v43 = vpop.f32.mrb[14].mxu0 }
 0x768   : > { %v1037_v44 = vmul.f32 0.5, %v1031_v40  ;;  %v1035_v45 = vpop.f32.mrb[15].mxu0 }
 0x769   : > { %v1038_v46 = vmul.f32 0.5, %v1033_v42 }
 0x76a   : > { %2026 = vtanh.f32 %v1037_v44 }
 0x76b   : > { %2028 = vtanh.f32 %v1038_v46 }
 0x774   : > { %v2027_v49 = vpop.eup %2026 }
 0x775   : > { %v2029_v32 = vpop.eup %2028  ;;  %v1041_v47 = vmul.f32 0.5, %v2027_v49 }
 0x776   : > { %v1042_v51 = vmul.f32 0.5, %v2029_v32 }
 0x777   : > { %v1043_v48 = vadd.f32 0.5, %v1041_v47 }
 0x778   : > { %v1044_v50 = vadd.f32 0.5, %v1042_v51 }
 0x779   : > { %v2621_v33 = vmul.f32 %v1043_v48, %v1031_v40 }
 0x77a   : > { %v2623_v52 = vmul.f32 %v1044_v50, %v1033_v42 }
 0x77b   : > { %v1049_v53 = vpack.c.bf16 %v2621_v33, %v2621_v33 }
 0x77c   : > { %v2629_v54 = vpack.c.bf16 %v2623_v52, %v2623_v52 }
 0x77d   : > { %v2632_v55 = vsel %vm326_vm1, %v1049_v53, 0 }
 0x77e   : > { %1942 = vmatprep.subr.msk.bf16.mxu1 %vm326_vm1, %v2629_v54 }
 0x77f   : > { %1066 = vmatpush1.bf16.msra.mxu1 %v2632_v55 }
 0x782   : > { %1943 = vmatmul.mubr.msk.bf16.vlgmr.msra.gmra.mrb[12].mxu1 %vm322_vm2, %v1047_v10 }
 0x783   : > { %1238 = vmatprep.mubr.bf16.mxu1 %v2098_v4 }
 0x855   : > { %v1099_v12 = vpop.f32.mrb[12].mxu1 }
 0x856   : > { %v1100_v17 = vadd.f32 %v1099_v12, %v1054_v11  ;;  %v1101_v18 = vpop.f32.mrb[13].mxu1 }
 0x857   : > { %v1102_v19 = vadd.f32 %v1101_v18, %v1054_v11  ;;  %v1103_v56 = vpop.f32.mrb[14].mxu1 }
 0x858   : > { %v1106_v9 = vmul.f32 0.5, %v1100_v17  ;;  %v1104_v7 = vpop.f32.mrb[15].mxu1 }
 0x859   : > { %v1107_v20 = vmul.f32 0.5, %v1102_v19 }
 0x85a   : > { %2030 = vtanh.f32 %v1106_v9 }
 0x85b   : > { %2032 = vtanh.f32 %v1107_v20 }
 0x864   : > { %v2031_v8 = vpop.eup %2030 }
 0x865   : > { %v2033_v21 = vpop.eup %2032  ;;  %v1110_v23 = vmul.f32 0.5, %v2031_v8 }
 0x866   : > { %v1111_v27 = vmul.f32 0.5, %v2033_v21 }
 0x867   : > { %v1112_v28 = vadd.f32 0.5, %v1110_v23 }
 0x868   : > { %v1113_v31 = vadd.f32 0.5, %v1111_v27 }
 0x869   : > { %v2642_v59 = vmul.f32 %v1112_v28, %v1100_v17 }
 0x86a   : > { %v2644_v62 = vmul.f32 %v1113_v31, %v1102_v19 }
 0x86b   : > { %1118 = vrot.lane.b32.xlu0 %v2642_v59, %s2100_s24 }
 0x86c   : > { %1120 = vrot.lane.b32.xlu1 %v2644_v62, %s2100_s24 }
 0x86f   : > { %1126 = vrot.lane.b32.xlu0 %v2642_v59, %s2099_s21 }
 0x870   : > { %1128 = vrot.lane.b32.xlu1 %v2644_v62, %s2099_s21 }
 0x873   : > { %1134 = vrot.lane.b32.xlu0 %v2642_v59, %s2101_s25 }
 0x874   : > { %1136 = vrot.lane.b32.xlu1 %v2644_v62, %s2101_s25 }
 0x877   : > { %1142 = vrot.lane.b32.xlu0 %v2642_v59, %s2102_s26 }
 0x878   : > { %1144 = vrot.lane.b32.xlu1 %v2644_v62, %s2102_s26 }
 0x87b   : > { %1150 = vrot.lane.b32.xlu0 %v2642_v59, %s2103_s27 }
 0x87c   : > { %1152 = vrot.lane.b32.xlu1 %v2644_v62, %s2103_s27 }
 0x87f   : > { %1158 = vrot.lane.b32.xlu0 %v2642_v59, %s2104_s28 }
 0x880   : > { %1160 = vrot.lane.b32.xlu1 %v2644_v62, %s2104_s28 }
 0x883   : > { %1166 = vrot.lane.b32.xlu0 %v2642_v59, %s2105_s29 }
 0x884   : > { %1168 = vrot.lane.b32.xlu1 %v2644_v62, %s2105_s29 }
 0x887   : > { %1174 = vrot.lane.b32.xlu0 %v2642_v59, %s2106_s30 }
 0x888   : > { %1176 = vrot.lane.b32.xlu1 %v2644_v62, %s2106_s30 }
 0x88b   : > { %1194 = vperm.xlu0 %1997, %v1117_v58  }
 0x8dd   : > { %v1119_v60 = vpop.permute.xlu0 %1118 }
 0x8de   : > { %v1121_v34 = vpop.permute.xlu1 %1120 }
 0x8df   : > { %v1122_v35 = vsel %vm392_vm3, %v1119_v60, %v1121_v34  ;;  %v1123_v36 = vsel %vm392_vm3, %v1121_v34, %v1119_v60 }
 0x8e0   : > { %v1124_v43 = vmul.f32 %v1123_v36, %v2270_v0  ;;  %v1125_v44 = vmul.f32 %v1122_v35, %v2273_v1 }
 0x8e1   : > { %v1127_v39 = vpop.permute.xlu0 %1126 }
 0x8e2   : > { %v1129_v40 = vpop.permute.xlu1 %1128 }
 0x8e3   : > { %v1130_v41 = vsel %vm413_vm4, %v1127_v39, %v1129_v40  ;;  %v1131_v42 = vsel %vm413_vm4, %v1129_v40, %v1127_v39 }
 0x8e4   : > { %v1132_v45 = vmul.f32 %v1131_v42, %v2277_v2  ;;  %v1133_v46 = vmul.f32 %v1130_v41, %v2280_v3 }
 0x8e5   : > { %v1135_v49 = vpop.permute.xlu0 %1134 }
 0x8e6   : > { %v1182_v32 = vpack.c.bf16 %v1132_v45, %v1124_v43  ;;  %v1137_v47 = vpop.permute.xlu1 %1136  ;;  %v1183_v51 = vpack.c.bf16 %v1133_v46, %v1125_v44 }
 0x8e7   : > { %v1138_v48 = vsel %vm435_vm5, %v1135_v49, %v1137_v47  ;;  %v1139_v50 = vsel %vm435_vm5, %v1137_v47, %v1135_v49 }
 0x8e8   : > { %1206 = vmatprep.subr.bf16.mxu1 %v1183_v51  ;;  %v1140_v17 = vmul.f32 %v1139_v50, %v2302_v22  ;;  %v1141_v18 = vmul.f32 %v1138_v48, %v2305_v24 }
 0x8e9   : > { %1207 = vmatpush1.bf16.msra.mxu1 %v1182_v32  ;;  %v1143_v53 = vpop.permute.xlu0 %1142 }
 0x8ea   : > { %v1145_v10 = vpop.permute.xlu1 %1144 }
 0x8eb   : > { %v1146_v11 = vsel %vm457_vm6, %v1143_v53, %v1145_v10  ;;  %v1147_v12 = vsel %vm457_vm6, %v1145_v10, %v1143_v53 }
 0x8ec   : > { %v1148_v19 = vmul.f32 %v1147_v12, %v2309_v25  ;;  %v1149_v56 = vmul.f32 %v1146_v11, %v2312_v26 }
 0x8ed   : > { %v1151_v9 = vpop.permute.xlu0 %1150 }
 0x8ee   : > { %v1184_v7 = vpack.c.bf16 %v1148_v19, %v1140_v17  ;;  %v1153_v20 = vpop.permute.xlu1 %1152  ;;  %v1185_v8 = vpack.c.bf16 %v1149_v56, %v1141_v18  ;;  %v1116_v18 = vld [vmem:[%s3023_s2 + $0x24] sm:$0xf]  ;;  %v1400_v19 = vld [vmem:[%s3023_s2 + $0x2c] sm:$0xf] }
 0x8ef   : > { %v1154_v21 = vsel %vm479_vm7, %v1151_v9, %v1153_v20  ;;  %v1155_v23 = vsel %vm479_vm7, %v1153_v20, %v1151_v9 }
 0x8f0   : > { %v1156_v27 = vmul.f32 %v1154_v21, %v2327_v37  ;;  %v1157_v28 = vmul.f32 %v1155_v23, %v2330_v38  ;;  %1208 = vmatprep.subr.bf16.mxu1 %v1185_v8 }
 0x8f1   : > { %1209 = vmatpush1.bf16.msra.mxu1 %v1184_v7  ;;  %v1159_v31 = vpop.permute.xlu0 %1158 }
 0x8f2   : > { %v1186_v58 = vpack.c.bf16 %v1156_v27, %v2642_v59  ;;  %v1161_v60 = vpop.permute.xlu1 %1160  ;;  %v1187_v34 = vpack.c.bf16 %v1157_v28, %v2644_v62 }
 0x8f3   : > { %v1162_v35 = vsel %vm501_vm8, %v1159_v31, %v1161_v60  ;;  %v1163_v36 = vsel %vm501_vm8, %v1161_v60, %v1159_v31 }
 0x8f4   : > { %1210 = vmatprep.subr.bf16.mxu1 %v1187_v34  ;;  %v1164_v43 = vmul.f32 %v1162_v35, %v2352_v61  ;;  %v1165_v44 = vmul.f32 %v1163_v36, %v2355_v63 }
 0x8f5   : > { %1211 = vmatpush1.bf16.msra.mxu1 %v1186_v58  ;;  %v1167_v39 = vpop.permute.xlu0 %1166 }
 0x8f6   : > { %v1169_v40 = vpop.permute.xlu1 %1168 }
 0x8f7   : > { %v1170_v41 = vsel %vm523_vm9, %v1167_v39, %v1169_v40  ;;  %v1171_v42 = vsel %vm523_vm9, %v1169_v40, %v1167_v39  ;;  %v1258_v40 = vld [vmem:[%s3024_s3 + $0x50] sm:$0xff] }
 0x8f8   : > { %v1172_v45 = vmul.f32 %v1170_v41, %v2359_v5  ;;  %v1173_v46 = vmul.f32 %v1171_v42, %v2362_v6  ;;  %v1401_v41 = vld [vmem:[%s3024_s3 + $0x58] sm:$0xff] }
 0x8f9   : > { %v1175_v49 = vpop.permute.xlu0 %1174 }
 0x8fa   : > { %v1188_v32 = vpack.c.bf16 %v1172_v45, %v1164_v43  ;;  %v1177_v47 = vpop.permute.xlu1 %1176  ;;  %v1189_v51 = vpack.c.bf16 %v1173_v46, %v1165_v44  ;;  %v1462_v44 = vld [vmem:[%s3024_s3 + $0x60] sm:$0xff] }
 0x8fb   : > { %v1178_v48 = vsel %vm545_vm10, %v1175_v49, %v1177_v47  ;;  %v1179_v50 = vsel %vm545_vm10, %v1177_v47, %v1175_v49 }
 0x8fc   : > { %v1180_v53 = vmul.f32 %v1178_v48, %v2377_v13  ;;  %v1181_v10 = vmul.f32 %v1179_v50, %v2380_v16  ;;  %1212 = vmatprep.subr.bf16.mxu1 %v1189_v51 }
 0x8fd   : > { %1213 = vmatpush1.bf16.msra.mxu1 %v1188_v32 }
 0x8fe   : > { %v1190_v11 = vpack.c.bf16 %v1180_v53, %v1180_v53  ;;  %v1191_v12 = vpack.c.bf16 %v1181_v10, %v1181_v10 }
 0x900   : > { %1944 = vmatprep.subr.msk.bf16.mxu1 %vm326_vm1, %v1191_v12  ;;  %v1201_v17 = vsel %vm326_vm1, %v1190_v11, 0 }
 0x901   : > { %1215 = vmatpush1.bf16.msra.mxu1 %v1201_v17 }
 0x902   : > { %1948 = vmatprep.subr.msk.bf16.mxu1 %vm326_vm1, %v2629_v54 }
 0x904   : > { %1945 = vmatmul.mubr.msk.bf16.vlgmr.msra.gmra.mrb[16].mxu1 %vm578_vm11, %v1116_v18 }
 0x905   : > { %1411 = vmatpush1.bf16.msra.mxu1 %v2632_v55  ;;  %1442 = vmatprep.mubr.bf16.mxu1 %v2098_v4 }
 0x90a   : > { %v1195_v56 = vpop.permute.xlu0 %1194 }
 0x90c   : > { %1949 = vmatmul.mubr.msk.bf16.vlgmr.msra.gmra.mrb[20].mxu1 %vm322_vm2, %v1400_v19 }
 0x90d   : > { %1505 = vmatprep.mubr.bf16.mxu1 %v2098_v4 }
 0x9d7   : > { %v1240_v9 = vpop.f32.mrb[16].mxu1 }
 0x9d8   : > { %v1241_v7 = vadd.f32 %v1240_v9, %v1195_v56  ;;  %v1242_v20 = vpop.f32.mrb[17].mxu1 }
 0x9d9   : > { %v1243_v8 = vadd.f32 %v1242_v20, %v1195_v56  ;;  %v1244_v54 = vpop.f32.mrb[18].mxu1 }
 0x9da   : > { %v1247_v21 = vmul.f32 0.5, %v1241_v7  ;;  %v1245_v23 = vpop.f32.mrb[19].mxu1 }
 0x9db   : > { %v1248_v27 = vmul.f32 0.5, %v1243_v8 }
 0x9dc   : > { %2034 = vtanh.f32 %v1247_v21 }
 0x9dd   : > { %2036 = vtanh.f32 %v1248_v27 }
 0x9df   : > { %v2778_v39 = vpop.f32.mrb[20].mxu1 }
 0x9e0   : > { %v2790_v42 = vpop.f32.mrb[21].mxu1 }
 0x9e1   : > { %v1448_v43 = vpop.f32.mrb[22].mxu1 }
 0x9e2   : > { %v1449_v45 = vpop.f32.mrb[23].mxu1 }
 0x9e6   : > { %v2035_v55 = vpop.eup %2034 }
 0x9e7   : > { %v2037_v28 = vpop.eup %2036  ;;  %v1251_v31 = vmul.f32 0.5, %v2035_v55 }
 0x9e8   : > { %v1252_v58 = vmul.f32 0.5, %v2037_v28 }
 0x9e9   : > { %v1253_v60 = vadd.f32 0.5, %v1251_v31 }
 0x9ea   : > { %v1254_v34 = vadd.f32 0.5, %v1252_v58 }
 0x9eb   : > { %v2746_v35 = vmul.f32 %v1253_v60, %v1241_v7 }
 0x9ec   : > { %v2748_v36 = vmul.f32 %v1254_v34, %v1243_v8 }
 0x9ed   : > { %1259 = vrot.lane.b32.xlu1 %v2746_v35, %s2100_s24 }
 0x9ee   : > { %1261 = vrot.lane.b32.xlu0 %v2748_v36, %s2100_s24 }
 0x9f1   : > { %1267 = vrot.lane.b32.xlu1 %v2746_v35, %s2099_s21 }
 0x9f2   : > { %1269 = vrot.lane.b32.xlu0 %v2748_v36, %s2099_s21 }
 0x9f5   : > { %1275 = vrot.lane.b32.xlu1 %v2746_v35, %s2101_s25 }
 0x9f6   : > { %1277 = vrot.lane.b32.xlu0 %v2748_v36, %s2101_s25 }
 0x9f9   : > { %1283 = vrot.lane.b32.xlu1 %v2746_v35, %s2102_s26 }
 0x9fa   : > { %1285 = vrot.lane.b32.xlu0 %v2748_v36, %s2102_s26 }
 0x9fd   : > { %1291 = vrot.lane.b32.xlu1 %v2746_v35, %s2103_s27 }
 0x9fe   : > { %1293 = vrot.lane.b32.xlu0 %v2748_v36, %s2103_s27 }
 0xa01   : > { %1299 = vrot.lane.b32.xlu1 %v2746_v35, %s2104_s28 }
 0xa02   : > { %1301 = vrot.lane.b32.xlu0 %v2748_v36, %s2104_s28 }
 0xa05   : > { %1307 = vrot.lane.b32.xlu1 %v2746_v35, %s2105_s29 }
 0xa06   : > { %1309 = vrot.lane.b32.xlu0 %v2748_v36, %s2105_s29 }
 0xa09   : > { %1315 = vrot.lane.b32.xlu1 %v2746_v35, %s2106_s30 }
 0xa0a   : > { %1317 = vrot.lane.b32.xlu0 %v2748_v36, %s2106_s30 }
 0xa0d   : > { %1335 = vperm.xlu1 %1998, %v1258_v40  }
 0xa0e   : > { %1404 = vperm.xlu0 %1997, %v1401_v41  }
 0xa11   : > { %1467 = vperm.xlu1 %1998, %v1462_v44  }
 0xa5f   : > { %v1260_v46 = vpop.permute.xlu1 %1259 }
 0xa60   : > { %v1262_v49 = vpop.permute.xlu0 %1261 }
 0xa61   : > { %v1263_v32 = vsel %vm392_vm3, %v1260_v46, %v1262_v49  ;;  %v1264_v47 = vsel %vm392_vm3, %v1262_v49, %v1260_v46 }
 0xa62   : > { %v1265_v10 = vmul.f32 %v1264_v47, %v2270_v0  ;;  %v1266_v11 = vmul.f32 %v1263_v32, %v2273_v1 }
 0xa63   : > { %v1268_v51 = vpop.permute.xlu1 %1267 }
 0xa64   : > { %v1270_v48 = vpop.permute.xlu0 %1269 }
 0xa65   : > { %v1271_v50 = vsel %vm413_vm4, %v1268_v51, %v1270_v48  ;;  %v1272_v53 = vsel %vm413_vm4, %v1270_v48, %v1268_v51 }
 0xa66   : > { %v1273_v12 = vmul.f32 %v1272_v53, %v2277_v2  ;;  %v1274_v17 = vmul.f32 %v1271_v50, %v2280_v3 }
 0xa67   : > { %v1276_v18 = vpop.permute.xlu1 %1275 }
 0xa68   : > { %v1323_v19 = vpack.c.bf16 %v1273_v12, %v1265_v10  ;;  %v1278_v56 = vpop.permute.xlu0 %1277  ;;  %v1324_v9 = vpack.c.bf16 %v1274_v17, %v1266_v11 }
 0xa69   : > { %v1279_v7 = vsel %vm435_vm5, %v1276_v18, %v1278_v56  ;;  %v1280_v20 = vsel %vm435_vm5, %v1278_v56, %v1276_v18 }
 0xa6a   : > { %1347 = vmatprep.subr.bf16.mxu0 %v1324_v9  ;;  %v1281_v27 = vmul.f32 %v1280_v20, %v2302_v22  ;;  %v1282_v55 = vmul.f32 %v1279_v7, %v2305_v24 }
 0xa6b   : > { %1348 = vmatpush1.bf16.msra.mxu0 %v1323_v19  ;;  %v1284_v8 = vpop.permute.xlu1 %1283 }
 0xa6c   : > { %v1286_v54 = vpop.permute.xlu0 %1285 }
 0xa6d   : > { %v1287_v21 = vsel %vm457_vm6, %v1284_v8, %v1286_v54  ;;  %v1288_v23 = vsel %vm457_vm6, %v1286_v54, %v1284_v8 }
 0xa6e   : > { %v1289_v28 = vmul.f32 %v1288_v23, %v2309_v25  ;;  %v1290_v31 = vmul.f32 %v1287_v21, %v2312_v26 }
 0xa6f   : > { %v1292_v58 = vpop.permute.xlu1 %1291 }
 0xa70   : > { %v1325_v60 = vpack.c.bf16 %v1289_v28, %v1281_v27  ;;  %v1294_v34 = vpop.permute.xlu0 %1293  ;;  %v1326_v40 = vpack.c.bf16 %v1290_v31, %v1282_v55  ;;  %v1257_v55 = vld [vmem:[%s3023_s2 + $0x28] sm:$0xf] }
 0xa71   : > { %v1295_v41 = vsel %vm479_vm7, %v1292_v58, %v1294_v34  ;;  %v1296_v43 = vsel %vm479_vm7, %v1294_v34, %v1292_v58 }
 0xa72   : > { %v1297_v44 = vmul.f32 %v1295_v41, %v2327_v37  ;;  %v1298_v45 = vmul.f32 %v1296_v43, %v2330_v38  ;;  %1349 = vmatprep.subr.bf16.mxu0 %v1326_v40 }
 0xa73   : > { %1350 = vmatpush1.bf16.msra.mxu0 %v1325_v60  ;;  %v1300_v46 = vpop.permute.xlu1 %1299 }
 0xa74   : > { %v1327_v49 = vpack.c.bf16 %v1297_v44, %v2746_v35  ;;  %v1302_v32 = vpop.permute.xlu0 %1301  ;;  %v1328_v47 = vpack.c.bf16 %v1298_v45, %v2748_v36 }
 0xa75   : > { %v1303_v51 = vsel %vm501_vm8, %v1300_v46, %v1302_v32  ;;  %v1304_v48 = vsel %vm501_vm8, %v1302_v32, %v1300_v46 }
 0xa76   : > { %1351 = vmatprep.subr.bf16.mxu0 %v1328_v47  ;;  %v1305_v35 = vmul.f32 %v1303_v51, %v2352_v61  ;;  %v1306_v36 = vmul.f32 %v1304_v48, %v2355_v63 }
 0xa77   : > { %1352 = vmatpush1.bf16.msra.mxu0 %v1327_v49  ;;  %v1308_v50 = vpop.permute.xlu1 %1307 }
 0xa78   : > { %v1310_v53 = vpop.permute.xlu0 %1309 }
 0xa79   : > { %v1311_v10 = vsel %vm523_vm9, %v1308_v50, %v1310_v53  ;;  %v1312_v11 = vsel %vm523_vm9, %v1310_v53, %v1308_v50 }
 0xa7a   : > { %v1313_v12 = vmul.f32 %v1311_v10, %v2359_v5  ;;  %v1314_v17 = vmul.f32 %v1312_v11, %v2362_v6 }
 0xa7b   : > { %v1316_v18 = vpop.permute.xlu1 %1315 }
 0xa7c   : > { %v1329_v19 = vpack.c.bf16 %v1313_v12, %v1305_v35  ;;  %v1318_v56 = vpop.permute.xlu0 %1317  ;;  %v1330_v9 = vpack.c.bf16 %v1314_v17, %v1306_v36 }
 0xa7d   : > { %v1319_v7 = vsel %vm545_vm10, %v1316_v18, %v1318_v56  ;;  %v1320_v20 = vsel %vm545_vm10, %v1318_v56, %v1316_v18 }
 0xa7e   : > { %v1321_v8 = vmul.f32 %v1319_v7, %v2377_v13  ;;  %v1322_v54 = vmul.f32 %v1320_v20, %v2380_v16  ;;  %1353 = vmatprep.subr.bf16.mxu0 %v1330_v9 }
 0xa7f   : > { %1354 = vmatpush1.bf16.msra.mxu0 %v1329_v19 }
 0xa80   : > { %v1331_v21 = vpack.c.bf16 %v1321_v8, %v1321_v8  ;;  %v1332_v23 = vpack.c.bf16 %v1322_v54, %v1322_v54 }
 0xa82   : > { %1946 = vmatprep.subr.msk.bf16.mxu0 %vm326_vm1, %v1332_v23  ;;  %v1342_v27 = vsel %vm326_vm1, %v1331_v21, 0  ;;  %v1461_v21 = vld [vmem:[%s3023_s2 + $0x30] sm:$0xf] }
 0xa83   : > { %1356 = vmatpush1.bf16.msra.mxu0 %v1342_v27 }
 0xa86   : > { %1947 = vmatmul.mubr.msk.bf16.vlgmr.msra.gmra.mrb[16].mxu0 %vm578_vm11, %v1257_v55 }
 0xa87   : > { %1646 = vmatprep.mubr.bf16.mxu0 %v2098_v4 }
 0xa8c   : > { %v1336_v40 = vpop.permute.xlu1 %1335 }
 0xa8d   : > { %v1405_v28 = vpop.permute.xlu0 %1404 }
 0xa8e   : > { %v1445_v31 = vadd.f32 %v2778_v39, %v1405_v28  ;;  %v1447_v58 = vadd.f32 %v2790_v42, %v1405_v28 }
 0xa90   : > { %v1451_v60 = vmul.f32 0.5, %v1445_v31  ;;  %v1452_v34 = vmul.f32 0.5, %v1447_v58  ;;  %v1468_v23 = vpop.permute.xlu1 %1467 }
 0xa92   : > { %2038 = vtanh.f32 %v1451_v60 }
 0xa93   : > { %2040 = vtanh.f32 %v1452_v34 }
 0xa9c   : > { %v2039_v51 = vpop.eup %2038 }
 0xa9d   : > { %v2041_v48 = vpop.eup %2040  ;;  %v1455_v39 = vmul.f32 0.5, %v2039_v51  ;;  %v1669_v51 = vld [vmem:[%s3024_s3 + $0x70] sm:$0xff] }
 0xa9e   : > { %v1456_v42 = vmul.f32 0.5, %v2041_v48  ;;  %v1670_v48 = vld [vmem:[%s3024_s3 + $0x78] sm:$0xff] }
 0xa9f   : > { %v1457_v35 = vadd.f32 0.5, %v1455_v39  ;;  %v1671_v39 = vld [vmem:[%s3024_s3 + $0x80] sm:$0xff] }
 0xaa0   : > { %v1458_v12 = vadd.f32 0.5, %v1456_v42 }
 0xaa1   : > { %v1459_v56 = vmul.f32 %v1457_v35, %v1445_v31 }
 0xaa2   : > { %v1460_v7 = vmul.f32 %v1458_v12, %v1447_v58 }
 0xb59   : > { %v1381_v41 = vpop.f32.mrb[16].mxu0 }
 0xb5a   : > { %v1382_v43 = vadd.f32 %v1381_v41, %v1336_v40  ;;  %v1383_v44 = vpop.f32.mrb[17].mxu0 }
 0xb5b   : > { %v1384_v45 = vadd.f32 %v1383_v44, %v1336_v40  ;;  %v1385_v46 = vpop.f32.mrb[18].mxu0 }
 0xb5c   : > { %v1388_v49 = vmul.f32 0.5, %v1382_v43  ;;  %v1386_v32 = vpop.f32.mrb[19].mxu0 }
 0xb5d   : > { %v1389_v47 = vmul.f32 0.5, %v1384_v45  ;;  %v227_v32 = vld [vmem:[%s3024_s3] sm:$0xff] }
 0xb5e   : > { %2042 = vtanh.f32 %v1388_v49 }
 0xb5f   : > { %2044 = vtanh.f32 %v1389_v47  ;;  %v1525_v47 = vld [vmem:[%s3024_s3 + $0x68] sm:$0xff] }
 0xb68   : > { %v2043_v50 = vpop.eup %2042 }
 0xb69   : > { %v2045_v53 = vpop.eup %2044  ;;  %v1392_v10 = vmul.f32 0.5, %v2043_v50  ;;  %v1672_v50 = vld [vmem:[%s3024_s3 + $0x88] sm:$0xff] }
 0xb6a   : > { %v1393_v11 = vmul.f32 0.5, %v2045_v53 }
 0xb6b   : > { %v1394_v36 = vadd.f32 0.5, %v1392_v10 }
 0xb6c   : > { %v1395_v17 = vadd.f32 0.5, %v1393_v11 }
 0xb6d   : > { %v1396_v18 = vmul.f32 %v1394_v36, %v1382_v43 }
 0xb6e   : > { %v1397_v19 = vmul.f32 %v1395_v17, %v1384_v45 }
 0xb6f   : > { %v1398_v9 = vadd.f32 %v1396_v18, %v2642_v59 }
 0xb70   : > { %v1399_v20 = vadd.f32 %v1397_v19, %v2644_v62 }
 0xb71   : > { %v1463_v8 = vpack.c.bf16 %v1459_v56, %v1398_v9 }
 0xb72   : > { %v1464_v54 = vpack.c.bf16 %v1460_v7, %v1399_v20 }
 0xb74   : > { %1473 = vmatprep.subr.bf16.mxu1 %v1464_v54 }
 0xb75   : > { %1474 = vmatpush1.bf16.msra.mxu1 %v1463_v8 }
 0xb78   : > { %1950 = vmatmul.mubr.msk.bf16.vlgmr.msra.gmra.mrb[24].mxu1 %vm246_vm0, %v1461_v21 }
 0xb79   : > { %1746 = vmatprep.mubr.bf16.mxu1 %v2098_v4 }
 0xc4b   : > { %v1507_v27 = vpop.f32.mrb[24].mxu1 }
 0xc4c   : > { %v1508_v55 = vadd.f32 %v1507_v27, %v1468_v23  ;;  %v1509_v28 = vpop.f32.mrb[25].mxu1 }
 0xc4d   : > { %v1510_v59 = vadd.f32 %v1509_v28, %v1468_v23  ;;  %v1511_v31 = vpop.f32.mrb[26].mxu1 }
 0xc4e   : > { %v1514_v58 = vmul.f32 0.5, %v1508_v55  ;;  %v1512_v62 = vpop.f32.mrb[27].mxu1 }
 0xc4f   : > { %v1515_v60 = vmul.f32 0.5, %v1510_v59 }
 0xc50   : > { %2046 = vtanh.f32 %v1514_v58 }
 0xc51   : > { %2048 = vtanh.f32 %v1515_v60 }
 0xc5a   : > { %v2047_v34 = vpop.eup %2046 }
 0xc5b   : > { %v2049_v40 = vpop.eup %2048  ;;  %v1518_v41 = vmul.f32 0.5, %v2047_v34 }
 0xc5c   : > { %v1519_v43 = vmul.f32 0.5, %v2049_v40 }
 0xc5d   : > { %v1520_v44 = vadd.f32 0.5, %v1518_v41 }
 0xc5e   : > { %v1521_v45 = vadd.f32 0.5, %v1519_v43 }
 0xc5f   : > { %v2861_v46 = vmul.f32 %v1520_v44, %v1508_v55 }
 0xc60   : > { %v2863_v49 = vmul.f32 %v1521_v45, %v1510_v59 }
 0xc61   : > { %1526 = vrot.lane.b32.xlu0 %v2861_v46, %s2100_s24 }
 0xc62   : > { %1528 = vrot.lane.b32.xlu1 %v2863_v49, %s2100_s24 }
 0xc65   : > { %1534 = vrot.lane.b32.xlu0 %v2861_v46, %s2099_s21 }
 0xc66   : > { %1536 = vrot.lane.b32.xlu1 %v2863_v49, %s2099_s21  ;;  %s1921_s21 = sshll.u32 %s194_s5, 6 }
 0xc67   : > { %s2986_s24 = scalar_lea.vmem [#allocation3], %s1921_s21 }
 0xc69   : > { %1542 = vrot.lane.b32.xlu0 %v2861_v46, %s2101_s25 }
 0xc6a   : > { %1544 = vrot.lane.b32.xlu1 %v2863_v49, %s2101_s25 }
 0xc6d   : > { %1550 = vrot.lane.b32.xlu0 %v2861_v46, %s2102_s26 }
 0xc6e   : > { %1552 = vrot.lane.b32.xlu1 %v2863_v49, %s2102_s26  ;;  %s1824_s26 = scalar_lea.vmem (%p2162_p5), %s3025_s4, %s1963_s15 }
 0xc71   : > { %1558 = vrot.lane.b32.xlu0 %v2861_v46, %s2103_s27 }
 0xc72   : > { %1560 = vrot.lane.b32.xlu1 %v2863_v49, %s2103_s27 }
 0xc75   : > { %1566 = vrot.lane.b32.xlu0 %v2861_v46, %s2104_s28 }
 0xc76   : > { %1568 = vrot.lane.b32.xlu1 %v2863_v49, %s2104_s28 }
 0xc79   : > { %1574 = vrot.lane.b32.xlu0 %v2861_v46, %s2105_s29 }
 0xc7a   : > { %1576 = vrot.lane.b32.xlu1 %v2863_v49, %s2105_s29 }
 0xc7d   : > { %1582 = vrot.lane.b32.xlu0 %v2861_v46, %s2106_s30 }
 0xc7e   : > { %1584 = vrot.lane.b32.xlu1 %v2863_v49, %s2106_s30 }
 0xc81   : > { %233 = vperm.xlu0 %1997, %v227_v32  }
 0xc82   : > { %1602 = vperm.xlu1 %1998, %v1525_v47  }
 0xc85   : > { %1679 = vperm.xlu0 %1997, %v1669_v51  }
 0xc86   : > { %1684 = vperm.xlu1 %1998, %v1670_v48  }
 0xc89   : > { %1689 = vperm.xlu0 %1997, %v1671_v39  }
 0xc8a   : > { %1694 = vperm.xlu1 %1998, %v1672_v50  }
 0xcd3   : > { %v1527_v42 = vpop.permute.xlu0 %1526 }
 0xcd4   : > { %v1529_v53 = vpop.permute.xlu1 %1528 }
 0xcd5   : > { %v1530_v10 = vsel %vm392_vm3, %v1527_v42, %v1529_v53  ;;  %v1531_v11 = vsel %vm392_vm3, %v1529_v53, %v1527_v42 }
 0xcd6   : > { %v1532_v18 = vmul.f32 %v1531_v11, %v2270_v0  ;;  %v1533_v19 = vmul.f32 %v1530_v10, %v2273_v1 }
 0xcd7   : > { %v1535_v35 = vpop.permute.xlu0 %1534 }
 0xcd8   : > { %v1537_v36 = vpop.permute.xlu1 %1536 }
 0xcd9   : > { %v1538_v12 = vsel %vm413_vm4, %v1535_v35, %v1537_v36  ;;  %v1539_v17 = vsel %vm413_vm4, %v1537_v36, %v1535_v35  ;;  %v1524_v36 = vld [vmem:[%s3023_s2 + $0x34] sm:$0xf] }
 0xcda   : > { %v1540_v56 = vmul.f32 %v1539_v17, %v2277_v2  ;;  %v1541_v9 = vmul.f32 %v1538_v12, %v2280_v3 }
 0xcdb   : > { %v1543_v7 = vpop.permute.xlu0 %1542 }
 0xcdc   : > { %v1590_v20 = vpack.c.bf16 %v1540_v56, %v1532_v18  ;;  %v1545_v8 = vpop.permute.xlu1 %1544  ;;  %v1591_v54 = vpack.c.bf16 %v1541_v9, %v1533_v19 }
 0xcdd   : > { %v1546_v21 = vsel %vm435_vm5, %v1543_v7, %v1545_v8  ;;  %v1547_v23 = vsel %vm435_vm5, %v1545_v8, %v1543_v7 }
 0xcde   : > { %1614 = vmatprep.subr.bf16.mxu0 %v1591_v54  ;;  %v1548_v3 = vmul.f32 %v1547_v23, %v2302_v22  ;;  %v1549_v55 = vmul.f32 %v1546_v21, %v2305_v24 }
 0xcdf   : > { %1615 = vmatpush1.bf16.msra.mxu0 %v1590_v20  ;;  %v1551_v27 = vpop.permute.xlu0 %1550 }
 0xce0   : > { %v1553_v0 = vpop.permute.xlu1 %1552 }
 0xce1   : > { %v1554_v1 = vsel %vm457_vm6, %v1551_v27, %v1553_v0  ;;  %v1555_v2 = vsel %vm457_vm6, %v1553_v0, %v1551_v27 }
 0xce2   : > { %v1556_v28 = vmul.f32 %v1555_v2, %v2309_v25  ;;  %v1557_v59 = vmul.f32 %v1554_v1, %v2312_v26 }
 0xce3   : > { %v1559_v31 = vpop.permute.xlu0 %1558 }
 0xce4   : > { %v1592_v58 = vpack.c.bf16 %v1556_v28, %v1548_v3  ;;  %v1561_v62 = vpop.permute.xlu1 %1560  ;;  %v1593_v60 = vpack.c.bf16 %v1557_v59, %v1549_v55 }
 0xce5   : > { %v1562_v34 = vsel %vm479_vm7, %v1559_v31, %v1561_v62  ;;  %v1563_v40 = vsel %vm479_vm7, %v1561_v62, %v1559_v31 }
 0xce6   : > { %v1564_v41 = vmul.f32 %v1562_v34, %v2327_v37  ;;  %v1565_v22 = vmul.f32 %v1563_v40, %v2330_v38  ;;  %1616 = vmatprep.subr.bf16.mxu0 %v1593_v60 }
 0xce7   : > { %1617 = vmatpush1.bf16.msra.mxu0 %v1592_v58  ;;  %v1567_v24 = vpop.permute.xlu0 %1566 }
 0xce8   : > { %v1594_v25 = vpack.c.bf16 %v1564_v41, %v2861_v46  ;;  %v1569_v26 = vpop.permute.xlu1 %1568  ;;  %v1595_v43 = vpack.c.bf16 %v1565_v22, %v2863_v49  ;;  %v2000_v22 = vld [vmem:[%s3023_s2 + $0x38] sm:$0xff]  }
 0xce9   : > { %v1570_v44 = vsel %vm501_vm8, %v1567_v24, %v1569_v26  ;;  %v1571_v45 = vsel %vm501_vm8, %v1569_v26, %v1567_v24  ;;  %v2001_v24 = vld [vmem:[%s3023_s2 + $0x40] sm:$0xff]  }
 0xcea   : > { %1618 = vmatprep.subr.bf16.mxu0 %v1595_v43  ;;  %v1572_v46 = vmul.f32 %v1570_v44, %v2352_v61  ;;  %v1573_v49 = vmul.f32 %v1571_v45, %v2355_v63 }
 0xceb   : > { %1619 = vmatpush1.bf16.msra.mxu0 %v1594_v25  ;;  %v1575_v32 = vpop.permute.xlu0 %1574 }
 0xcec   : > { %v1577_v37 = vpop.permute.xlu1 %1576 }
 0xced   : > { %v1578_v38 = vsel %vm523_vm9, %v1575_v32, %v1577_v37  ;;  %v1579_v47 = vsel %vm523_vm9, %v1577_v37, %v1575_v32 }
 0xcee   : > { %v1580_v51 = vmul.f32 %v1578_v38, %v2359_v5  ;;  %v1581_v48 = vmul.f32 %v1579_v47, %v2362_v6 }
 0xcef   : > { %v1583_v39 = vpop.permute.xlu0 %1582 }
 0xcf0   : > { %v1596_v50 = vpack.c.bf16 %v1580_v51, %v1572_v46  ;;  %v1585_v42 = vpop.permute.xlu1 %1584  ;;  %v1597_v53 = vpack.c.bf16 %v1581_v48, %v1573_v49 }
 0xcf1   : > { %v1586_v10 = vsel %vm545_vm10, %v1583_v39, %v1585_v42  ;;  %v1587_v11 = vsel %vm545_vm10, %v1585_v42, %v1583_v39 }
 0xcf2   : > { %v1588_v35 = vmul.f32 %v1586_v10, %v2377_v13  ;;  %v1589_v61 = vmul.f32 %v1587_v11, %v2380_v16  ;;  %1620 = vmatprep.subr.bf16.mxu0 %v1597_v53 }
 0xcf3   : > { %1621 = vmatpush1.bf16.msra.mxu0 %v1596_v50 }
 0xcf4   : > { %v1598_v63 = vpack.c.bf16 %v1588_v35, %v1588_v35  ;;  %v1599_v5 = vpack.c.bf16 %v1589_v61, %v1589_v61 }
 0xcf6   : > { %1951 = vmatprep.subr.msk.bf16.mxu0 %vm326_vm1, %v1599_v5  ;;  %v1609_v6 = vsel %vm326_vm1, %v1598_v63, 0 }
 0xcf7   : > { %1623 = vmatpush1.bf16.msra.mxu0 %v1609_v6 }
 0xcfa   : > { %1952 = vmatmul.mubr.msk.bf16.vlgmr.msra.gmra.mrb[20].mxu0 %vm578_vm11, %v1524_v36 }
 0xd00   : > { %v234_v57 = vpop.permute.xlu0 %233 }
 0xd01   : > { %v285_v13 = vadd.f32 %v2192_v14, %v234_v57  ;;  %v287_v16 = vadd.f32 %v2194_v15, %v234_v57  ;;  %v1603_v14 = vpop.permute.xlu1 %1602 }
 0xd03   : > { %v293_v12 = vmul.f32 0.5, %v285_v13  ;;  %v294_v17 = vmul.f32 0.5, %v287_v16 }
 0xd04   : > { %v1680_v25 = vpop.permute.xlu0 %1679 }
 0xd05   : > { %2050 = vtanh.f32 %v293_v12 }
 0xd06   : > { %2052 = vtanh.f32 %v294_v17 }
 0xd08   : > { %v1690_v51 = vpop.permute.xlu0 %1689 }
 0xd0f   : > { %v2051_v18 = vpop.eup %2050 }
 0xd10   : > { %v2053_v19 = vpop.eup %2052  ;;  %v301_v56 = vmul.f32 0.5, %v2051_v18 }
 0xd11   : > { %v302_v9 = vmul.f32 0.5, %v2053_v19 }
 0xd12   : > { %v305_v7 = vadd.f32 0.5, %v301_v56 }
 0xd13   : > { %v306_v20 = vadd.f32 0.5, %v302_v9 }
 0xd14   : > { %v309_v8 = vmul.f32 %v305_v7, %v285_v13 }
 0xd15   : > { %v310_v54 = vmul.f32 %v306_v20, %v287_v16 }
 0xd16   : > { %v1673_v21 = vpack.c.bf16 %v2196_v29, %v309_v8 }
 0xd17   : > { %v1674_v23 = vpack.c.bf16 %v2198_v30, %v310_v54 }
 0xd19   : > { %1714 = vmatprep.subr.bf16.mxu1 %v1674_v23 }
 0xd1a   : > { %1715 = vmatpush1.bf16.msra.mxu1 %v1673_v21 }
 0xdcd   : > { %v1648_v15 = vpop.f32.mrb[20].mxu0 }
 0xdce   : > { %v1649_v27 = vadd.f32 %v1648_v15, %v1603_v14  ;;  %v1650_v0 = vpop.f32.mrb[21].mxu0 }
 0xdcf   : > { %v1651_v1 = vadd.f32 %v1650_v0, %v1603_v14  ;;  %v1652_v2 = vpop.f32.mrb[22].mxu0 }
 0xdd0   : > { %v1655_v3 = vmul.f32 0.5, %v1649_v27  ;;  %v1653_v55 = vpop.f32.mrb[23].mxu0 }
 0xdd1   : > { %v1656_v28 = vmul.f32 0.5, %v1651_v1 }
 0xdd2   : > { %2054 = vtanh.f32 %v1655_v3 }
 0xdd3   : > { %2056 = vtanh.f32 %v1656_v28 }
 0xddc   : > { %v2055_v59 = vpop.eup %2054 }
 0xddd   : > { %v2057_v31 = vpop.eup %2056  ;;  %v1659_v58 = vmul.f32 0.5, %v2055_v59 }
 0xdde   : > { %v1660_v62 = vmul.f32 0.5, %v2057_v31 }
 0xddf   : > { %v1661_v29 = vadd.f32 0.5, %v1659_v58 }
 0xde0   : > { %v1662_v60 = vadd.f32 0.5, %v1660_v62 }
 0xde1   : > { %v1663_v30 = vmul.f32 %v1661_v29, %v1649_v27 }
 0xde2   : > { %v1664_v34 = vmul.f32 %v1662_v60, %v1651_v1 }
 0xde3   : > { %v1675_v41 = vpack.c.bf16 %v1663_v30, %v2621_v33  ;;  %v1685_v33 = vpop.permute.xlu1 %1684 }
 0xde4   : > { %v1676_v40 = vpack.c.bf16 %v1664_v34, %v2623_v52 }
 0xde6   : > { %1716 = vmatprep.subr.bf16.mxu1 %v1676_v40 }
 0xde7   : > { %1717 = vmatpush1.bf16.msra.mxu1 %v1675_v41  ;;  %v1695_v42 = vpop.permute.xlu1 %1694 }
 0xdea   : > { %1955 = vmatmul.mubr.msk.bf16.vlgmr.msra.gmra.mrb[28].mxu1 %vm1707_vm12, %v2000_v22 }
 0xdeb   : > { %1756 = vmatprep.mubr.bf16.mxu1 %v2098_v4 }
 0xdf2   : > { %1956 = vmatmul.mubr.msk.bf16.gmra.mrb[32].mxu1 %vm1707_vm12, %v2001_v24 }
 0xebd   : > { %v1748_v26 = vpop.f32.mrb[28].mxu1 }
 0xebe   : > { %v1749_v52 = vadd.f32 %v1748_v26, %v1680_v25  ;;  %v1750_v43 = vpop.f32.mrb[29].mxu1 }
 0xebf   : > { %v1751_v44 = vadd.f32 %v1750_v43, %v1680_v25  ;;  %v1752_v45 = vpop.f32.mrb[30].mxu1 }
 0xec0   : > { %v1767_v32 = vmul.f32 0.5, %v1749_v52  ;;  %v1753_v37 = vadd.f32 %v1752_v45, %v1685_v33  ;;  %v1754_v38 = vpop.f32.mrb[31].mxu1 }
 0xec1   : > { %v1768_v47 = vmul.f32 0.5, %v1751_v44  ;;  %v1755_v46 = vadd.f32 %v1754_v38, %v1685_v33 }
 0xec2   : > { %2058 = vtanh.f32 %v1767_v32  ;;  %v1769_v49 = vmul.f32 0.5, %v1753_v37 }
 0xec3   : > { %2060 = vtanh.f32 %v1768_v47  ;;  %v1770_v4 = vmul.f32 0.5, %v1755_v46 }
 0xec4   : > { %2062 = vtanh.f32 %v1769_v49 }
 0xec5   : > { %2064 = vtanh.f32 %v1770_v4  ;;  %v1758_v48 = vpop.f32.mrb[32].mxu1 }
 0xec6   : > { %v1759_v39 = vadd.f32 %v1758_v48, %v1690_v51  ;;  %v1760_v50 = vpop.f32.mrb[33].mxu1 }
 0xec7   : > { %v1761_v53 = vadd.f32 %v1760_v50, %v1690_v51  ;;  %v1762_v10 = vpop.f32.mrb[34].mxu1 }
 0xec8   : > { %v1771_v11 = vmul.f32 0.5, %v1759_v39  ;;  %v1763_v35 = vadd.f32 %v1762_v10, %v1695_v42  ;;  %v1764_v61 = vpop.f32.mrb[35].mxu1 }
 0xec9   : > { %v1772_v63 = vmul.f32 0.5, %v1761_v53  ;;  %v1765_v5 = vadd.f32 %v1764_v61, %v1695_v42 }
 0xeca   : > { %2066 = vtanh.f32 %v1771_v11  ;;  %v1773_v6 = vmul.f32 0.5, %v1763_v35 }
 0xecb   : > { %2068 = vtanh.f32 %v1772_v63  ;;  %v1774_v36 = vmul.f32 0.5, %v1765_v5 }
 0xecc   : > { %v2059_v57 = vpop.eup %2058  ;;  %2070 = vtanh.f32 %v1773_v6 }
 0xecd   : > { %v2061_v13 = vpop.eup %2060  ;;  %v1783_v16 = vmul.f32 0.5, %v2059_v57  ;;  %2072 = vtanh.f32 %v1774_v36 }
 0xece   : > { %v2063_v12 = vpop.eup %2062  ;;  %v1784_v17 = vmul.f32 0.5, %v2061_v13 }
 0xecf   : > { %v2065_v18 = vpop.eup %2064  ;;  %v1791_v19 = vadd.f32 0.5, %v1783_v16  ;;  %v1785_v56 = vmul.f32 0.5, %v2063_v12 }
 0xed0   : > { %v1792_v9 = vadd.f32 0.5, %v1784_v17  ;;  %v1786_v7 = vmul.f32 0.5, %v2065_v18 }
 0xed1   : > { %v1799_v20 = vmul.f32 %v1791_v19, %v1749_v52  ;;  %v1793_v8 = vadd.f32 0.5, %v1785_v56 }
 0xed2   : > { %v1800_v54 = vmul.f32 %v1792_v9, %v1751_v44  ;;  %v1794_v21 = vadd.f32 0.5, %v1786_v7 }
 0xed3   : > { %1807 = vst [vmem:[%s2986_s24] sm:$0xff] %v1799_v20  ;;  %v1801_v23 = vmul.f32 %v1793_v8, %v1753_v37 }
 0xed4   : > { %v2067_v14 = vpop.eup %2066  ;;  %1808 = vst [vmem:[%s2986_s24 + $0x8] sm:$0xff] %v1800_v54  ;;  %v1802_v15 = vmul.f32 %v1794_v21, %v1755_v46 }
 0xed5   : > { %v2069_v27 = vpop.eup %2068  ;;  %1809 = vst [vmem:[%s2986_s24 + $0x10] sm:$0xff] %v1801_v23  ;;  %v1787_v0 = vmul.f32 0.5, %v2067_v14 }
 0xed6   : > { %v2071_v1 = vpop.eup %2070  ;;  %1810 = vst [vmem:[%s2986_s24 + $0x18] sm:$0xff] %v1802_v15  ;;  %v1788_v2 = vmul.f32 0.5, %v2069_v27 }
 0xed7   : > { %v2073_v3 = vpop.eup %2072  ;;  %v1795_v55 = vadd.f32 0.5, %v1787_v0  ;;  %v1789_v28 = vmul.f32 0.5, %v2071_v1 }
 0xed8   : > { %v1796_v59 = vadd.f32 0.5, %v1788_v2  ;;  %v1790_v31 = vmul.f32 0.5, %v2073_v3  ;;  %1821 = sbr.rel (!%p2162_p5) target bundleno = 3815 (0xee7), region = 63 }
 0xed9   : > { %v1803_v58 = vmul.f32 %v1795_v55, %v1759_v39  ;;  %v1797_v62 = vadd.f32 0.5, %v1789_v28 }
 0xeda   : > { %v1804_v29 = vmul.f32 %v1796_v59, %v1761_v53  ;;  %v1798_v60 = vadd.f32 0.5, %v1790_v31  ;;  %v1837_v40 = vld [vmem:[%s2986_s24] sm:$0xff] (%p2162_p5) }
 0xedb   : > { %1811 = vst [vmem:[%s2986_s24 + $0x20] sm:$0xff] %v1803_v58  ;;  %v1805_v30 = vmul.f32 %v1797_v62, %v1763_v35  ;;  %v1839_v41 = vld [vmem:[%s2986_s24 + $0x8] sm:$0xff] (%p2162_p5)  ;;  %1838 = vst [vmem:[%s1824_s26] sm:$0xff] (%p2162_p5), %v1837_v40 }
 0xedc   : > { %1812 = vst [vmem:[%s2986_s24 + $0x28] sm:$0xff] %v1804_v29  ;;  %v1806_v34 = vmul.f32 %v1798_v60, %v1765_v5  ;;  %v1841_v22 = vld [vmem:[%s2986_s24 + $0x10] sm:$0xff] (%p2162_p5)  ;;  %1840 = vst [vmem:[%s1824_s26 + $0x8] sm:$0xff] (%p2162_p5), %v1839_v41 }
 0xedd   : > { %1813 = vst [vmem:[%s2986_s24 + $0x30] sm:$0xff] %v1805_v30  ;;  %v1843_v24 = vld [vmem:[%s2986_s24 + $0x18] sm:$0xff] (%p2162_p5)  ;;  %1842 = vst [vmem:[%s1824_s26 + $0x20] sm:$0xff] (%p2162_p5), %v1841_v22 }
 0xede   : > { %1814 = vst [vmem:[%s2986_s24 + $0x38] sm:$0xff] %v1806_v34  ;;  %1844 = vst [vmem:[%s1824_s26 + $0x28] sm:$0xff] (%p2162_p5), %v1843_v24 }
 0xee2   : > { %v1845_v25 = vld [vmem:[%s2986_s24 + $0x20] sm:$0xff] }
 0xee3   : > { %v1847_v26 = vld [vmem:[%s2986_s24 + $0x28] sm:$0xff]  ;;  %1846 = vst [vmem:[%s1824_s26 + $0x40] sm:$0xff] %v1845_v25 }
 0xee4   : > { %1848 = vst [vmem:[%s1824_s26 + $0x48] sm:$0xff] %v1847_v26  ;;  %v1849_v52 = vld [vmem:[%s2986_s24 + $0x30] sm:$0xff] }
 0xee5   : > { %v1851_v43 = vld [vmem:[%s2986_s24 + $0x38] sm:$0xff]  ;;  %1850 = vst [vmem:[%s1824_s26 + $0x60] sm:$0xff] %v1849_v52 }
 0xee6   : > { %1852 = vst [vmem:[%s1824_s26 + $0x68] sm:$0xff] %v1851_v43 }
 0xee7 PF: > { %p11_p10 = scmp.ge.s32.totalorder %s2149_s19, 4   ;;  %s3027_s15 = smov %s2092_s16 }
 0xee8   : > { %s3028_s16 = smov %s2160_s22  ;;  %s3029_s17 = smov %s2149_s19 }
 0xee9   :  { %13 = sbr.rel (!%p11_p10) target bundleno = 2 (0x2), region = 124 }

</bundles_post_ra>
